<compile_context>
chip_gen: v7x
topology: tpu7x:2x2x1
jax: 0.10.0
libtpu: 0.0.40
codegen_flags: <defaults>
</compile_context>

<pallas_src>
import functools

import jax
import jax.numpy as jnp
from jax import lax
from jax.experimental import pallas as pl
from jax.experimental.pallas import tpu as pltpu

BQ_GRU = 8  # GRU timesteps statically unrolled per block (one f32 sublane group)


# --------------------------------------------------------------------------
# Pallas kernel: blockwise masked additive self-attention + fused GRU.
# --------------------------------------------------------------------------
def _self_interactor_kernel(
    n_real, hdim, out_dim, bqa,
    # ---- inputs ----
    x_ref,        # (N_pad, d)               f32
    wtop_ref,     # (d, 2*hdim + 3*out)      bf16   [W1^T | W2^T | W_ix^T]
    btop_ref,     # (1, 2*hdim + 3*out)      f32    [b1   | b2   | b_ih  ]
    vw_ref,       # (1, hdim)                f32
    wiatt_t_ref,  # (d, 3*out)               bf16   W_iatt^T (att-half of W_ih)
    whh_t_ref,    # (out, 3*out)             bf16   [W_hr | W_hz | W_hn]^T
    bhh_ref,      # (1, 3*out)               f32
    # ---- output ----
    out_ref,      # (N_pad, out)             f32
    # ---- scratch ----
    q_scr,        # (N_pad, hdim)            f32
    k_scr,        # (N_pad, hdim)            f32
    gi_scr,       # (N_pad, 3*out)           f32    full GRU input projection
    xbf_scr,      # (N_pad, d)               bf16   staged bf16 copy of X
):
    n_pad = x_ref.shape[0]

    # Stage X as bf16 once; reused by every value matmul (no per-block recast).
    x_bf = x_ref[...].astype(jnp.bfloat16)
    xbf_scr[...] = x_bf

    # One fused, full-height MXU matmul: attention q/k projections + the
    # attention-independent half of the GRU input projection, for ALL rows.
    qkg = jnp.dot(x_bf, wtop_ref[...], preferred_element_type=jnp.float32) + btop_ref[...]
    q_scr[...] = qkg[:, :hdim]
    k_scr[...] = qkg[:, hdim:2 * hdim]
    gi_scr[...] = qkg[:, 2 * hdim:]          # = X @ W_ix^T + b_ih

    # Loop invariants, hoisted (JAX does not CSE broadcast_in_dim inside loops).
    vw_b = vw_ref[...].astype(jnp.bfloat16).reshape(1, 1, hdim)
    b_hh = bhh_ref[...]
    whh_bf = whh_t_ref[...]

    # ------------------------------------------------------------------
    # Phase A: masked additive self-attention + att-half of the GRU input
    # projection.  Independent per query block; updates gi_scr in place.
    # ------------------------------------------------------------------
    def attn_body(b, carry):
        base = pl.multiple_of(b * bqa, bqa)
        q_blk = q_scr[pl.ds(base, bqa), :]                 # (bqa, H)
        k_all = k_scr[...]                                 # (N_pad, H)

        # bf16 tanh: bf16 EUP path on v6e/v7x and half the vreg footprint.
        # TODO(synk): for large N, key-tile this with an online softmax so the
        # (bqa, N_pad, H) intermediate stays vreg-resident instead of spilling.
        e = jnp.tanh((q_blk[:, None, :] + k_all[None, :, :]).astype(jnp.bfloat16))
        scores = jnp.sum((e * vw_b).astype(jnp.float32), axis=-1)   # (bqa, N_pad)
        # (the additive-attention score bias vb cancels in the softmax -> dropped)

        row_ids = base + lax.broadcasted_iota(jnp.int32, (bqa, n_pad), 0)
        col_ids = lax.broadcasted_iota(jnp.int32, (bqa, n_pad), 1)
        valid = (col_ids >= row_ids) & (col_ids < n_real)  # row i attends to j >= i
        scores = jnp.where(valid, scores, -1e30)

        m = jnp.max(scores, axis=-1, keepdims=True)
        p = jnp.exp(scores - m)
        attn = p * pl.reciprocal(jnp.sum(p, axis=-1, keepdims=True), approx=True)
        att_blk = jnp.dot(attn.astype(jnp.bfloat16), xbf_scr[...],
                          preferred_element_type=jnp.float32)        # (bqa, d)

        # Complete the GRU input projection for this block (att-half only).
        gi_scr[pl.ds(base, bqa), :] = (
            gi_scr[pl.ds(base, bqa), :]
            + jnp.dot(att_blk.astype(jnp.bfloat16), wiatt_t_ref[...],
                      preferred_element_type=jnp.float32))
        return carry

    # TODO(synk): on v7x, split phase A into its own pallas_call with a ("parallel",)
    # grid over query blocks so both TensorCores contribute; the GRU recurrence
    # below is inherently sequential over N.
    lax.fori_loop(0, n_pad // bqa, attn_body, 0)

    # ------------------------------------------------------------------
    # Phase B: sequential GRU recurrence (PyTorch gate order r, z, n).
    # Padded tail rows (i >= n_real) run on garbage inputs, but they come
    # strictly AFTER all valid rows, so they cannot pollute valid outputs;
    # the wrapper slices them off.
    # ------------------------------------------------------------------
    def gru_body(b, h):
        base = pl.multiple_of(b * BQ_GRU, BQ_GRU)
        gi_blk = gi_scr[pl.ds(base, BQ_GRU), :]            # (BQ_GRU, 3*out)
        rows = []
        for r in range(BQ_GRU):
            gi = gi_blk[r:r + 1, :]                        # (1, 3*out)
            # TODO(synk): keep whh resident in the MXU across the unrolled steps via
            # pltpu.matmul_push_rhs / matmul_acc_lhs / matmul_pop to avoid re-pushing
            # the RHS every step on this latency-bound serial path.
            gh = jnp.dot(h.astype(jnp.bfloat16), whh_bf,
                         preferred_element_type=jnp.float32) + b_hh
            rg = jax.nn.sigmoid(gi[:, :out_dim] + gh[:, :out_dim])
            zg = jax.nn.sigmoid(gi[:, out_dim:2 * out_dim] + gh[:, out_dim:2 * out_dim])
            ng = jnp.tanh(gi[:, 2 * out_dim:] + rg * gh[:, 2 * out_dim:])
            h = (1.0 - zg) * ng + zg * h
            rows.append(h)
        # lane/sublane-dense (8, out) tile store -- no per-row masked stores.
        out_ref[pl.ds(base, BQ_GRU), :] = jnp.concatenate(rows, axis=0)
        return h

    lax.fori_loop(0, n_pad // BQ_GRU, gru_body,
                  jnp.zeros((1, out_dim), jnp.float32))


# --------------------------------------------------------------------------
# Wrapper: parameter packing / pre-transpose (plain-JAX glue) + pallas_call
# --------------------------------------------------------------------------
def self_interactor(X, params):
    """Pallas forward of SelfInteractor: X (N, d) -> (N, d)."""
    N, d = X.shape
    hdim = d          # AdditiveAttention(dim, dim, dim)
    out_dim = d       # GRU hidden size
    n_pad = ((N + BQ_GRU - 1) // BQ_GRU) * BQ_GRU
    # Wider query block for the MXU-heavy attention phase when it divides N_pad.
    # TODO(synk): with key-tiling in place this could be raised to 64-128 rows.
    bqa = 16 if n_pad % 16 == 0 else 8

    x_pad = jnp.pad(X.astype(jnp.float32), ((0, n_pad - N), (0, 0)))

    # ---- pack / pre-transpose parameters once, outside the kernel ----
    w_ix_t = params["gru_wih"][:, :d].T             # (d, 3*out)  multiplies X
    w_iatt_t = params["gru_wih"][:, d:].T           # (d, 3*out)  multiplies att
    w_top = jnp.concatenate(
        [params["att_w1"].T, params["att_w2"].T, w_ix_t], axis=1).astype(jnp.bfloat16)
    b_top = jnp.concatenate(
        [params["att_b1"], params["att_b2"], params["gru_bih"]]
    ).reshape(1, -1).astype(jnp.float32)
    vw = params["att_vw"].reshape(1, hdim).astype(jnp.float32)
    # att_vb cancels in the softmax -> not passed to the kernel.
    wiatt_t = w_iatt_t.astype(jnp.bfloat16)
    whh_t = params["gru_whh"].T.astype(jnp.bfloat16)                 # (out, 3*out)
    b_hh = params["gru_bhh"].reshape(1, -1).astype(jnp.float32)

    vmem = pl.BlockSpec(memory_space=pltpu.MemorySpace.VMEM)

    # Explicit VMEM budget (v7x has 64 MiB physical / 32 MiB default scoped limit).
    resident = sum(int(a.size) * a.dtype.itemsize
                   for a in (x_pad, w_top, b_top, vw, wiatt_t, whh_t, b_hh))
    resident += n_pad * out_dim * 4            # output
    resident += 2 * n_pad * hdim * 4           # q / k scratch
    resident += n_pad * 3 * out_dim * 4        # gi scratch
    resident += n_pad * d * 2                  # bf16 X scratch
    vmem_limit = int(max(16 << 20, min(2 * resident + (2 << 20), 64 << 20)))

    out = pl.pallas_call(
        functools.partial(_self_interactor_kernel, N, hdim, out_dim, bqa),
        out_shape=jax.ShapeDtypeStruct((n_pad, out_dim), jnp.float32),
        in_specs=[vmem] * 7,
        out_specs=vmem,
        scratch_shapes=[
            pltpu.VMEM((n_pad, hdim), jnp.float32),
            pltpu.VMEM((n_pad, hdim), jnp.float32),
            pltpu.VMEM((n_pad, 3 * out_dim), jnp.float32),
            pltpu.VMEM((n_pad, d), jnp.bfloat16),
        ],
        compiler_params=pltpu.CompilerParams(vmem_limit_bytes=vmem_limit),
    )(x_pad, w_top, b_top, vw, wiatt_t, whh_t, b_hh)
    return out[:N]


# --------------------------------------------------------------------------
# Deterministic parameter init (matches the nn.Module's parameter shapes)
# --------------------------------------------------------------------------
def init_params(key, dim):
    ks = jax.random.split(key, 10)
    u = lambda k, shape, fan: jax.random.uniform(
        k, shape, jnp.float32, -1.0 / jnp.sqrt(fan), 1.0 / jnp.sqrt(fan))
    return {
        # AdditiveAttention(dim, dim, dim): Linear(dim, dim), Linear(dim, dim), Linear(dim, 1)
        "att_w1": u(ks[0], (dim, dim), dim),
        "att_b1": u(ks[1], (dim,), dim),
        "att_w2": u(ks[2], (dim, dim), dim),
        "att_b2": u(ks[3], (dim,), dim),
        "att_vw": u(ks[4], (dim,), dim),
        "att_vb": u(ks[5], (1,), dim),
        # GRU(2*dim, dim), single layer
        "gru_wih": u(ks[6], (3 * dim, 2 * dim), dim),
        "gru_whh": u(ks[7], (3 * dim, dim), dim),
        "gru_bih": u(ks[8], (3 * dim,), dim),
        "gru_bhh": u(ks[9], (3 * dim,), dim),
    }


# --------------------------------------------------------------------------
# Pure-JAX f32 reference (mirrors the PyTorch forward) for a sanity check
# --------------------------------------------------------------------------
def reference(X, params):
    N, d = X.shape
    q = X @ params["att_w1"].T + params["att_b1"]
    k = X @ params["att_w2"].T + params["att_b2"]
    e = jnp.tanh(q[:, None, :] + k[None, :, :])
    scores = e @ params["att_vw"] + params["att_vb"][0]
    mask = jnp.arange(N)[None, :] >= jnp.arange(N)[:, None]      # row i attends to j >= i
    scores = jnp.where(mask, scores, -jnp.inf)
    attn = jax.nn.softmax(scores, axis=-1)
    att = attn @ X
    x_cat = jnp.concatenate([X, att], axis=1)
    W_ih, W_hh = params["gru_wih"], params["gru_whh"]
    b_ih, b_hh = params["gru_bih"], params["gru_bhh"]
    h = jnp.zeros((d,), jnp.float32)
    outs = []
    for t in range(N):
        gi = W_ih @ x_cat[t] + b_ih
        gh = W_hh @ h + b_hh
        r = jax.nn.sigmoid(gi[:d] + gh[:d])
        z = jax.nn.sigmoid(gi[d:2 * d] + gh[d:2 * d])
        n = jnp.tanh(gi[2 * d:] + r * gh[2 * d:])
        h = (1.0 - z) * n + z * h
        outs.append(h)
    return jnp.stack(outs)


if __name__ == "__main__":
    # Small, lane-dense shapes: N proposals of dimension dim (dim multiple of 128
    # keeps every store/matmul lane-dense).
    N, dim = 16, 128

    key = jax.random.PRNGKey(0)
    kx, kp = jax.random.split(key)
    X = jax.random.normal(kx, (N, dim), jnp.float32)
    params = init_params(kp, dim)

    out = jax.block_until_ready(self_interactor(X, params))
    ref = reference(X, params)

    assert out.shape == (N, dim)
    err = float(jnp.max(jnp.abs(out - ref)))
    # bf16 MXU operands / bf16 tanh vs f32 reference
    assert err < 5e-2, err

    print("KERNEL_OK")
</pallas_src>

<mosaic_0001>
module attributes {stable_mosaic.version = 11 : i64} {
  func.func @_self_interactor_kernel(%arg0: memref<16x128xf32, #tpu.memory_space<vmem>>, %arg1: memref<128x640xbf16, #tpu.memory_space<vmem>>, %arg2: memref<1x640xf32, #tpu.memory_space<vmem>>, %arg3: memref<1x128xf32, #tpu.memory_space<vmem>>, %arg4: memref<128x384xbf16, #tpu.memory_space<vmem>>, %arg5: memref<128x384xbf16, #tpu.memory_space<vmem>>, %arg6: memref<1x384xf32, #tpu.memory_space<vmem>>, %arg7: memref<16x128xf32, #tpu.memory_space<vmem>>, %arg8: memref<16x128xf32, #tpu.memory_space<vmem>>, %arg9: memref<16x128xf32, #tpu.memory_space<vmem>>, %arg10: memref<16x384xf32, #tpu.memory_space<vmem>>, %arg11: memref<16x128xbf16, #tpu.memory_space<vmem>>) attributes {dimension_semantics = [], scalar_prefetch = 0 : i64, scratch_operands = 4 : i64, tpu.core_type = #tpu.core_type<tc>} {
    %c0 = arith.constant 0 : index
    %c0_0 = arith.constant 0 : index
    %0 = vector.load %arg0[%c0, %c0_0] : memref<16x128xf32, #tpu.memory_space<vmem>>, vector<16x128xf32>
    %1 = arith.truncf %0 : vector<16x128xf32> to vector<16x128xbf16>
    %c0_1 = arith.constant 0 : index
    %c0_2 = arith.constant 0 : index
    %2 = vector.load %arg11[%c0_1, %c0_2] : memref<16x128xbf16, #tpu.memory_space<vmem>>, vector<16x128xbf16>
    tpu.vector_store %arg11[%c0_1, %c0_2], %1 {strides = array<i32>} : memref<16x128xbf16, #tpu.memory_space<vmem>>, vector<16x128xbf16>,
    %c0_3 = arith.constant 0 : index
    %c0_4 = arith.constant 0 : index
    %3 = vector.load %arg1[%c0_3, %c0_4] : memref<128x640xbf16, #tpu.memory_space<vmem>>, vector<128x640xbf16>
    %cst = arith.constant dense<0.000000e+00> : vector<16x640xf32>
    %4 = tpu.matmul %1, %3, %cst {dimension_numbers = #tpu.dot_dimension_numbers<[1], [0], [0], [1], [0, 0, 1, 1], [], []>} : vector<16x128xbf16>, vector<128x640xbf16>, vector<16x640xf32> -> vector<16x640xf32>
    %c0_5 = arith.constant 0 : index
    %c0_6 = arith.constant 0 : index
    %5 = vector.load %arg2[%c0_5, %c0_6] : memref<1x640xf32, #tpu.memory_space<vmem>>, vector<1x640xf32>
    %6 = vector.broadcast %5 : vector<1x640xf32> to vector<16x640xf32>
    %7 = arith.addf %4, %6 : vector<16x640xf32>
    %8 = vector.extract_strided_slice %7 {offsets = [0, 0], sizes = [16, 128], strides = [1, 1]} : vector<16x640xf32> to vector<16x128xf32>
    %c0_7 = arith.constant 0 : index
    %c0_8 = arith.constant 0 : index
    %9 = vector.load %arg8[%c0_7, %c0_8] : memref<16x128xf32, #tpu.memory_space<vmem>>, vector<16x128xf32>
    tpu.vector_store %arg8[%c0_7, %c0_8], %8 {strides = array<i32>} : memref<16x128xf32, #tpu.memory_space<vmem>>, vector<16x128xf32>,
    %10 = vector.extract_strided_slice %7 {offsets = [0, 128], sizes = [16, 128], strides = [1, 1]} : vector<16x640xf32> to vector<16x128xf32>
    %c0_9 = arith.constant 0 : index
    %c0_10 = arith.constant 0 : index
    %11 = vector.load %arg9[%c0_9, %c0_10] : memref<16x128xf32, #tpu.memory_space<vmem>>, vector<16x128xf32>
    tpu.vector_store %arg9[%c0_9, %c0_10], %10 {strides = array<i32>} : memref<16x128xf32, #tpu.memory_space<vmem>>, vector<16x128xf32>,
    %12 = vector.extract_strided_slice %7 {offsets = [0, 256], sizes = [16, 384], strides = [1, 1]} : vector<16x640xf32> to vector<16x384xf32>
    %c0_11 = arith.constant 0 : index
    %c0_12 = arith.constant 0 : index
    %13 = vector.load %arg10[%c0_11, %c0_12] : memref<16x384xf32, #tpu.memory_space<vmem>>, vector<16x384xf32>
    tpu.vector_store %arg10[%c0_11, %c0_12], %12 {strides = array<i32>} : memref<16x384xf32, #tpu.memory_space<vmem>>, vector<16x384xf32>,
    %c0_13 = arith.constant 0 : index
    %c0_14 = arith.constant 0 : index
    %14 = vector.load %arg3[%c0_13, %c0_14] : memref<1x128xf32, #tpu.memory_space<vmem>>, vector<1x128xf32>
    %15 = arith.truncf %14 : vector<1x128xf32> to vector<1x128xbf16>
    %16 = vector.shape_cast %15 : vector<1x128xbf16> to vector<1x1x128xbf16>
    %c0_15 = arith.constant 0 : index
    %c0_16 = arith.constant 0 : index
    %17 = vector.load %arg6[%c0_15, %c0_16] : memref<1x384xf32, #tpu.memory_space<vmem>>, vector<1x384xf32>
    %c0_17 = arith.constant 0 : index
    %c0_18 = arith.constant 0 : index
    %18 = vector.load %arg5[%c0_17, %c0_18] : memref<128x384xbf16, #tpu.memory_space<vmem>>, vector<128x384xbf16>
    %c0_i32 = arith.constant 0 : i32
    %c16_i32 = arith.constant 16 : i32
    %19 = arith.muli %c0_i32, %c16_i32 : i32
    %20 = tpu.assume_multiple %19, 16 : i32
    %21 = arith.index_cast %20 : i32 to index
    %c0_19 = arith.constant 0 : index
    %22 = vector.load %arg8[%21, %c0_19] : memref<16x128xf32, #tpu.memory_space<vmem>>, vector<16x128xf32>
    %c0_20 = arith.constant 0 : index
    %c0_21 = arith.constant 0 : index
    %23 = vector.load %arg9[%c0_20, %c0_21] : memref<16x128xf32, #tpu.memory_space<vmem>>, vector<16x128xf32>
    %24 = vector.shape_cast %22 : vector<16x128xf32> to vector<16x1x128xf32>
    %25 = vector.shape_cast %23 : vector<16x128xf32> to vector<1x16x128xf32>
    %26 = vector.broadcast %24 : vector<16x1x128xf32> to vector<16x16x128xf32>
    %27 = vector.broadcast %25 : vector<1x16x128xf32> to vector<16x16x128xf32>
    %28 = arith.addf %26, %27 : vector<16x16x128xf32>
    %29 = arith.truncf %28 : vector<16x16x128xf32> to vector<16x16x128xbf16>
    %30 = math.tanh %29 : vector<16x16x128xbf16>
    %31 = vector.broadcast %16 : vector<1x1x128xbf16> to vector<16x16x128xbf16>
    %32 = arith.mulf %30, %31 : vector<16x16x128xbf16>
    %33 = arith.extf %32 : vector<16x16x128xbf16> to vector<16x16x128xf32>
    %cst_22 = arith.constant dense<0.000000e+00> : vector<16x16xf32>
    %34 = vector.multi_reduction <add>, %33, %cst_22 [2] : vector<16x16x128xf32> to vector<16x16xf32>
    %35 = tpu.iota {dimensions = array<i32: 0>} : vector<16x16xi32>
    %36 = vector.broadcast %20 : i32 to vector<16x16xi32>
    %37 = arith.addi %36, %35 : vector<16x16xi32>
    %38 = tpu.iota {dimensions = array<i32: 1>} : vector<16x16xi32>
    %39 = arith.cmpi sge, %38, %37 : vector<16x16xi32>
    %c16_i32_23 = arith.constant 16 : i32
    %40 = vector.broadcast %c16_i32_23 : i32 to vector<16x16xi32>
    %41 = arith.cmpi slt, %38, %40 : vector<16x16xi32>
    %42 = arith.andi %39, %41 : vector<16x16xi1>
    %cst_24 = arith.constant -1.000000e+30 : f32
    %43 = vector.broadcast %cst_24 : f32 to vector<16x16xf32>
    %44 = arith.select %42, %34, %43 : vector<16x16xi1>, vector<16x16xf32>
    %cst_25 = arith.constant dense<0xFF800000> : vector<16xf32>
    %45 = vector.multi_reduction <maximumf>, %44, %cst_25 [1] : vector<16x16xf32> to vector<16xf32>
    %46 = vector.shape_cast %45 : vector<16xf32> to vector<16x1xf32>
    %47 = vector.broadcast %46 : vector<16x1xf32> to vector<16x16xf32>
    %48 = arith.subf %44, %47 : vector<16x16xf32>
    %49 = math.exp %48 : vector<16x16xf32>
    %cst_26 = arith.constant dense<0.000000e+00> : vector<16xf32>
    %50 = vector.multi_reduction <add>, %49, %cst_26 [1] : vector<16x16xf32> to vector<16xf32>
    %51 = vector.shape_cast %50 : vector<16xf32> to vector<16x1xf32>
    %52 = tpu.reciprocal %51 {approx = true} : vector<16x1xf32> -> vector<16x1xf32>
    %53 = vector.broadcast %52 : vector<16x1xf32> to vector<16x16xf32>
    %54 = arith.mulf %49, %53 : vector<16x16xf32>
    %55 = arith.truncf %54 : vector<16x16xf32> to vector<16x16xbf16>
    %c0_27 = arith.constant 0 : index
    %c0_28 = arith.constant 0 : index
    %56 = vector.load %arg11[%c0_27, %c0_28] : memref<16x128xbf16, #tpu.memory_space<vmem>>, vector<16x128xbf16>
    %cst_29 = arith.constant dense<0.000000e+00> : vector<16x128xf32>
    %57 = tpu.matmul %55, %56, %cst_29 {dimension_numbers = #tpu.dot_dimension_numbers<[1], [0], [0], [1], [0, 0, 1, 1], [], []>} : vector<16x16xbf16>, vector<16x128xbf16>, vector<16x128xf32> -> vector<16x128xf32>
    %58 = arith.index_cast %20 : i32 to index
    %c0_30 = arith.constant 0 : index
    %59 = vector.load %arg10[%58, %c0_30] : memref<16x384xf32, #tpu.memory_space<vmem>>, vector<16x384xf32>
    %60 = arith.truncf %57 : vector<16x128xf32> to vector<16x128xbf16>
    %c0_31 = arith.constant 0 : index
    %c0_32 = arith.constant 0 : index
    %61 = vector.load %arg4[%c0_31, %c0_32] : memref<128x384xbf16, #tpu.memory_space<vmem>>, vector<128x384xbf16>
    %cst_33 = arith.constant dense<0.000000e+00> : vector<16x384xf32>
    %62 = tpu.matmul %60, %61, %cst_33 {dimension_numbers = #tpu.dot_dimension_numbers<[1], [0], [0], [1], [0, 0, 1, 1], [], []>} : vector<16x128xbf16>, vector<128x384xbf16>, vector<16x384xf32> -> vector<16x384xf32>
    %63 = arith.addf %59, %62 : vector<16x384xf32>
    %64 = arith.index_cast %20 : i32 to index
    %c0_34 = arith.constant 0 : index
    %65 = vector.load %arg10[%64, %c0_34] : memref<16x384xf32, #tpu.memory_space<vmem>>, vector<16x384xf32>
    tpu.vector_store %arg10[%64, %c0_34], %63 {strides = array<i32>} : memref<16x384xf32, #tpu.memory_space<vmem>>, vector<16x384xf32>,
    %c1_i32 = arith.constant 1 : i32
    %cst_35 = arith.constant 0.000000e+00 : f32
    %66 = vector.broadcast %cst_35 : f32 to vector<1x128xf32>
    %c0_i32_36 = arith.constant 0 : i32
    %c2_i32 = arith.constant 2 : i32
    %67 = arith.addi %c0_i32_36, %c2_i32 : i32
    %c1_i32_37 = arith.constant 1 : i32
    %68 = scf.for %arg12 = %c0_i32_36 to %67 step %c1_i32_37 iter_args(%arg13 = %66) -> (vector<1x128xf32>)  : i32 {
      %c8_i32 = arith.constant 8 : i32
      %69 = arith.muli %arg12, %c8_i32 : i32
      %70 = tpu.assume_multiple %69, 8 : i32
      %71 = arith.index_cast %70 : i32 to index
      %c0_39 = arith.constant 0 : index
      %72 = vector.load %arg10[%71, %c0_39] : memref<16x384xf32, #tpu.memory_space<vmem>>, vector<8x384xf32>
      %73 = vector.extract_strided_slice %72 {offsets = [0, 0], sizes = [1, 384], strides = [1, 1]} : vector<8x384xf32> to vector<1x384xf32>
      %74 = arith.truncf %arg13 : vector<1x128xf32> to vector<1x128xbf16>
      %cst_40 = arith.constant dense<0.000000e+00> : vector<1x384xf32>
      %75 = tpu.matmul %74, %18, %cst_40 {dimension_numbers = #tpu.dot_dimension_numbers<[1], [0], [0], [1], [0, 0, 1, 1], [], []>} : vector<1x128xbf16>, vector<128x384xbf16>, vector<1x384xf32> -> vector<1x384xf32>
      %76 = arith.addf %75, %17 : vector<1x384xf32>
      %77 = vector.extract_strided_slice %73 {offsets = [0, 0], sizes = [1, 128], strides = [1, 1]} : vector<1x384xf32> to vector<1x128xf32>
      %78 = vector.extract_strided_slice %76 {offsets = [0, 0], sizes = [1, 128], strides = [1, 1]} : vector<1x384xf32> to vector<1x128xf32>
      %79 = arith.addf %77, %78 : vector<1x128xf32>
      %80 = arith.negf %79 : vector<1x128xf32>
      %81 = math.exp %80 : vector<1x128xf32>
      %cst_41 = arith.constant 1.000000e+00 : f32
      %82 = vector.broadcast %cst_41 : f32 to vector<1x128xf32>
      %83 = arith.addf %82, %81 : vector<1x128xf32>
      %84 = arith.divf %82, %83 : vector<1x128xf32>
      %85 = vector.extract_strided_slice %73 {offsets = [0, 128], sizes = [1, 128], strides = [1, 1]} : vector<1x384xf32> to vector<1x128xf32>
      %86 = vector.extract_strided_slice %76 {offsets = [0, 128], sizes = [1, 128], strides = [1, 1]} : vector<1x384xf32> to vector<1x128xf32>
      %87 = arith.addf %85, %86 : vector<1x128xf32>
      %88 = arith.negf %87 : vector<1x128xf32>
      %89 = math.exp %88 : vector<1x128xf32>
      %cst_42 = arith.constant 1.000000e+00 : f32
      %90 = vector.broadcast %cst_42 : f32 to vector<1x128xf32>
      %91 = arith.addf %90, %89 : vector<1x128xf32>
      %92 = arith.divf %90, %91 : vector<1x128xf32>
      %93 = vector.extract_strided_slice %73 {offsets = [0, 256], sizes = [1, 128], strides = [1, 1]} : vector<1x384xf32> to vector<1x128xf32>
      %94 = vector.extract_strided_slice %76 {offsets = [0, 256], sizes = [1, 128], strides = [1, 1]} : vector<1x384xf32> to vector<1x128xf32>
      %95 = arith.mulf %84, %94 : vector<1x128xf32>
      %96 = arith.addf %93, %95 : vector<1x128xf32>
      %97 = math.tanh %96 : vector<1x128xf32>
      %cst_43 = arith.constant 1.000000e+00 : f32
      %98 = vector.broadcast %cst_43 : f32 to vector<1x128xf32>
      %99 = arith.subf %98, %92 : vector<1x128xf32>
      %100 = arith.mulf %99, %97 : vector<1x128xf32>
      %101 = arith.mulf %92, %arg13 : vector<1x128xf32>
      %102 = arith.addf %100, %101 : vector<1x128xf32>
      %103 = vector.extract_strided_slice %72 {offsets = [1, 0], sizes = [1, 384], strides = [1, 1]} : vector<8x384xf32> to vector<1x384xf32>
      %104 = arith.truncf %102 : vector<1x128xf32> to vector<1x128xbf16>
      %cst_44 = arith.constant dense<0.000000e+00> : vector<1x384xf32>
      %105 = tpu.matmul %104, %18, %cst_44 {dimension_numbers = #tpu.dot_dimension_numbers<[1], [0], [0], [1], [0, 0, 1, 1], [], []>} : vector<1x128xbf16>, vector<128x384xbf16>, vector<1x384xf32> -> vector<1x384xf32>
      %106 = arith.addf %105, %17 : vector<1x384xf32>
      %107 = vector.extract_strided_slice %103 {offsets = [0, 0], sizes = [1, 128], strides = [1, 1]} : vector<1x384xf32> to vector<1x128xf32>
      %108 = vector.extract_strided_slice %106 {offsets = [0, 0], sizes = [1, 128], strides = [1, 1]} : vector<1x384xf32> to vector<1x128xf32>
      %109 = arith.addf %107, %108 : vector<1x128xf32>
      %110 = arith.negf %109 : vector<1x128xf32>
      %111 = math.exp %110 : vector<1x128xf32>
      %cst_45 = arith.constant 1.000000e+00 : f32
      %112 = vector.broadcast %cst_45 : f32 to vector<1x128xf32>
      %113 = arith.addf %112, %111 : vector<1x128xf32>
      %114 = arith.divf %112, %113 : vector<1x128xf32>
      %115 = vector.extract_strided_slice %103 {offsets = [0, 128], sizes = [1, 128], strides = [1, 1]} : vector<1x384xf32> to vector<1x128xf32>
      %116 = vector.extract_strided_slice %106 {offsets = [0, 128], sizes = [1, 128], strides = [1, 1]} : vector<1x384xf32> to vector<1x128xf32>
      %117 = arith.addf %115, %116 : vector<1x128xf32>
      %118 = arith.negf %117 : vector<1x128xf32>
      %119 = math.exp %118 : vector<1x128xf32>
      %cst_46 = arith.constant 1.000000e+00 : f32
      %120 = vector.broadcast %cst_46 : f32 to vector<1x128xf32>
      %121 = arith.addf %120, %119 : vector<1x128xf32>
      %122 = arith.divf %120, %121 : vector<1x128xf32>
      %123 = vector.extract_strided_slice %103 {offsets = [0, 256], sizes = [1, 128], strides = [1, 1]} : vector<1x384xf32> to vector<1x128xf32>
      %124 = vector.extract_strided_slice %106 {offsets = [0, 256], sizes = [1, 128], strides = [1, 1]} : vector<1x384xf32> to vector<1x128xf32>
      %125 = arith.mulf %114, %124 : vector<1x128xf32>
      %126 = arith.addf %123, %125 : vector<1x128xf32>
      %127 = math.tanh %126 : vector<1x128xf32>
      %cst_47 = arith.constant 1.000000e+00 : f32
      %128 = vector.broadcast %cst_47 : f32 to vector<1x128xf32>
      %129 = arith.subf %128, %122 : vector<1x128xf32>
      %130 = arith.mulf %129, %127 : vector<1x128xf32>
      %131 = arith.mulf %122, %102 : vector<1x128xf32>
      %132 = arith.addf %130, %131 : vector<1x128xf32>
      %133 = vector.extract_strided_slice %72 {offsets = [2, 0], sizes = [1, 384], strides = [1, 1]} : vector<8x384xf32> to vector<1x384xf32>
      %134 = arith.truncf %132 : vector<1x128xf32> to vector<1x128xbf16>
      %cst_48 = arith.constant dense<0.000000e+00> : vector<1x384xf32>
      %135 = tpu.matmul %134, %18, %cst_48 {dimension_numbers = #tpu.dot_dimension_numbers<[1], [0], [0], [1], [0, 0, 1, 1], [], []>} : vector<1x128xbf16>, vector<128x384xbf16>, vector<1x384xf32> -> vector<1x384xf32>
      %136 = arith.addf %135, %17 : vector<1x384xf32>
      %137 = vector.extract_strided_slice %133 {offsets = [0, 0], sizes = [1, 128], strides = [1, 1]} : vector<1x384xf32> to vector<1x128xf32>
      %138 = vector.extract_strided_slice %136 {offsets = [0, 0], sizes = [1, 128], strides = [1, 1]} : vector<1x384xf32> to vector<1x128xf32>
      %139 = arith.addf %137, %138 : vector<1x128xf32>
      %140 = arith.negf %139 : vector<1x128xf32>
      %141 = math.exp %140 : vector<1x128xf32>
      %cst_49 = arith.constant 1.000000e+00 : f32
      %142 = vector.broadcast %cst_49 : f32 to vector<1x128xf32>
      %143 = arith.addf %142, %141 : vector<1x128xf32>
      %144 = arith.divf %142, %143 : vector<1x128xf32>
      %145 = vector.extract_strided_slice %133 {offsets = [0, 128], sizes = [1, 128], strides = [1, 1]} : vector<1x384xf32> to vector<1x128xf32>
      %146 = vector.extract_strided_slice %136 {offsets = [0, 128], sizes = [1, 128], strides = [1, 1]} : vector<1x384xf32> to vector<1x128xf32>
      %147 = arith.addf %145, %146 : vector<1x128xf32>
      %148 = arith.negf %147 : vector<1x128xf32>
      %149 = math.exp %148 : vector<1x128xf32>
      %cst_50 = arith.constant 1.000000e+00 : f32
      %150 = vector.broadcast %cst_50 : f32 to vector<1x128xf32>
      %151 = arith.addf %150, %149 : vector<1x128xf32>
      %152 = arith.divf %150, %151 : vector<1x128xf32>
      %153 = vector.extract_strided_slice %133 {offsets = [0, 256], sizes = [1, 128], strides = [1, 1]} : vector<1x384xf32> to vector<1x128xf32>
      %154 = vector.extract_strided_slice %136 {offsets = [0, 256], sizes = [1, 128], strides = [1, 1]} : vector<1x384xf32> to vector<1x128xf32>
      %155 = arith.mulf %144, %154 : vector<1x128xf32>
      %156 = arith.addf %153, %155 : vector<1x128xf32>
      %157 = math.tanh %156 : vector<1x128xf32>
      %cst_51 = arith.constant 1.000000e+00 : f32
      %158 = vector.broadcast %cst_51 : f32 to vector<1x128xf32>
      %159 = arith.subf %158, %152 : vector<1x128xf32>
      %160 = arith.mulf %159, %157 : vector<1x128xf32>
      %161 = arith.mulf %152, %132 : vector<1x128xf32>
      %162 = arith.addf %160, %161 : vector<1x128xf32>
      %163 = vector.extract_strided_slice %72 {offsets = [3, 0], sizes = [1, 384], strides = [1, 1]} : vector<8x384xf32> to vector<1x384xf32>
      %164 = arith.truncf %162 : vector<1x128xf32> to vector<1x128xbf16>
      %cst_52 = arith.constant dense<0.000000e+00> : vector<1x384xf32>
      %165 = tpu.matmul %164, %18, %cst_52 {dimension_numbers = #tpu.dot_dimension_numbers<[1], [0], [0], [1], [0, 0, 1, 1], [], []>} : vector<1x128xbf16>, vector<128x384xbf16>, vector<1x384xf32> -> vector<1x384xf32>
      %166 = arith.addf %165, %17 : vector<1x384xf32>
      %167 = vector.extract_strided_slice %163 {offsets = [0, 0], sizes = [1, 128], strides = [1, 1]} : vector<1x384xf32> to vector<1x128xf32>
      %168 = vector.extract_strided_slice %166 {offsets = [0, 0], sizes = [1, 128], strides = [1, 1]} : vector<1x384xf32> to vector<1x128xf32>
      %169 = arith.addf %167, %168 : vector<1x128xf32>
      %170 = arith.negf %169 : vector<1x128xf32>
      %171 = math.exp %170 : vector<1x128xf32>
      %cst_53 = arith.constant 1.000000e+00 : f32
      %172 = vector.broadcast %cst_53 : f32 to vector<1x128xf32>
      %173 = arith.addf %172, %171 : vector<1x128xf32>
      %174 = arith.divf %172, %173 : vector<1x128xf32>
      %175 = vector.extract_strided_slice %163 {offsets = [0, 128], sizes = [1, 128], strides = [1, 1]} : vector<1x384xf32> to vector<1x128xf32>
      %176 = vector.extract_strided_slice %166 {offsets = [0, 128], sizes = [1, 128], strides = [1, 1]} : vector<1x384xf32> to vector<1x128xf32>
      %177 = arith.addf %175, %176 : vector<1x128xf32>
      %178 = arith.negf %177 : vector<1x128xf32>
      %179 = math.exp %178 : vector<1x128xf32>
      %cst_54 = arith.constant 1.000000e+00 : f32
      %180 = vector.broadcast %cst_54 : f32 to vector<1x128xf32>
      %181 = arith.addf %180, %179 : vector<1x128xf32>
      %182 = arith.divf %180, %181 : vector<1x128xf32>
      %183 = vector.extract_strided_slice %163 {offsets = [0, 256], sizes = [1, 128], strides = [1, 1]} : vector<1x384xf32> to vector<1x128xf32>
      %184 = vector.extract_strided_slice %166 {offsets = [0, 256], sizes = [1, 128], strides = [1, 1]} : vector<1x384xf32> to vector<1x128xf32>
      %185 = arith.mulf %174, %184 : vector<1x128xf32>
      %186 = arith.addf %183, %185 : vector<1x128xf32>
      %187 = math.tanh %186 : vector<1x128xf32>
      %cst_55 = arith.constant 1.000000e+00 : f32
      %188 = vector.broadcast %cst_55 : f32 to vector<1x128xf32>
      %189 = arith.subf %188, %182 : vector<1x128xf32>
      %190 = arith.mulf %189, %187 : vector<1x128xf32>
      %191 = arith.mulf %182, %162 : vector<1x128xf32>
      %192 = arith.addf %190, %191 : vector<1x128xf32>
      %193 = vector.extract_strided_slice %72 {offsets = [4, 0], sizes = [1, 384], strides = [1, 1]} : vector<8x384xf32> to vector<1x384xf32>
      %194 = arith.truncf %192 : vector<1x128xf32> to vector<1x128xbf16>
      %cst_56 = arith.constant dense<0.000000e+00> : vector<1x384xf32>
      %195 = tpu.matmul %194, %18, %cst_56 {dimension_numbers = #tpu.dot_dimension_numbers<[1], [0], [0], [1], [0, 0, 1, 1], [], []>} : vector<1x128xbf16>, vector<128x384xbf16>, vector<1x384xf32> -> vector<1x384xf32>
      %196 = arith.addf %195, %17 : vector<1x384xf32>
      %197 = vector.extract_strided_slice %193 {offsets = [0, 0], sizes = [1, 128], strides = [1, 1]} : vector<1x384xf32> to vector<1x128xf32>
      %198 = vector.extract_strided_slice %196 {offsets = [0, 0], sizes = [1, 128], strides = [1, 1]} : vector<1x384xf32> to vector<1x128xf32>
      %199 = arith.addf %197, %198 : vector<1x128xf32>
      %200 = arith.negf %199 : vector<1x128xf32>
      %201 = math.exp %200 : vector<1x128xf32>
      %cst_57 = arith.constant 1.000000e+00 : f32
      %202 = vector.broadcast %cst_57 : f32 to vector<1x128xf32>
      %203 = arith.addf %202, %201 : vector<1x128xf32>
      %204 = arith.divf %202, %203 : vector<1x128xf32>
      %205 = vector.extract_strided_slice %193 {offsets = [0, 128], sizes = [1, 128], strides = [1, 1]} : vector<1x384xf32> to vector<1x128xf32>
      %206 = vector.extract_strided_slice %196 {offsets = [0, 128], sizes = [1, 128], strides = [1, 1]} : vector<1x384xf32> to vector<1x128xf32>
      %207 = arith.addf %205, %206 : vector<1x128xf32>
      %208 = arith.negf %207 : vector<1x128xf32>
      %209 = math.exp %208 : vector<1x128xf32>
      %cst_58 = arith.constant 1.000000e+00 : f32
      %210 = vector.broadcast %cst_58 : f32 to vector<1x128xf32>
      %211 = arith.addf %210, %209 : vector<1x128xf32>
      %212 = arith.divf %210, %211 : vector<1x128xf32>
      %213 = vector.extract_strided_slice %193 {offsets = [0, 256], sizes = [1, 128], strides = [1, 1]} : vector<1x384xf32> to vector<1x128xf32>
      %214 = vector.extract_strided_slice %196 {offsets = [0, 256], sizes = [1, 128], strides = [1, 1]} : vector<1x384xf32> to vector<1x128xf32>
      %215 = arith.mulf %204, %214 : vector<1x128xf32>
      %216 = arith.addf %213, %215 : vector<1x128xf32>
      %217 = math.tanh %216 : vector<1x128xf32>
      %cst_59 = arith.constant 1.000000e+00 : f32
      %218 = vector.broadcast %cst_59 : f32 to vector<1x128xf32>
      %219 = arith.subf %218, %212 : vector<1x128xf32>
      %220 = arith.mulf %219, %217 : vector<1x128xf32>
      %221 = arith.mulf %212, %192 : vector<1x128xf32>
      %222 = arith.addf %220, %221 : vector<1x128xf32>
      %223 = vector.extract_strided_slice %72 {offsets = [5, 0], sizes = [1, 384], strides = [1, 1]} : vector<8x384xf32> to vector<1x384xf32>
      %224 = arith.truncf %222 : vector<1x128xf32> to vector<1x128xbf16>
      %cst_60 = arith.constant dense<0.000000e+00> : vector<1x384xf32>
      %225 = tpu.matmul %224, %18, %cst_60 {dimension_numbers = #tpu.dot_dimension_numbers<[1], [0], [0], [1], [0, 0, 1, 1], [], []>} : vector<1x128xbf16>, vector<128x384xbf16>, vector<1x384xf32> -> vector<1x384xf32>
      %226 = arith.addf %225, %17 : vector<1x384xf32>
      %227 = vector.extract_strided_slice %223 {offsets = [0, 0], sizes = [1, 128], strides = [1, 1]} : vector<1x384xf32> to vector<1x128xf32>
      %228 = vector.extract_strided_slice %226 {offsets = [0, 0], sizes = [1, 128], strides = [1, 1]} : vector<1x384xf32> to vector<1x128xf32>
      %229 = arith.addf %227, %228 : vector<1x128xf32>
      %230 = arith.negf %229 : vector<1x128xf32>
      %231 = math.exp %230 : vector<1x128xf32>
      %cst_61 = arith.constant 1.000000e+00 : f32
      %232 = vector.broadcast %cst_61 : f32 to vector<1x128xf32>
      %233 = arith.addf %232, %231 : vector<1x128xf32>
      %234 = arith.divf %232, %233 : vector<1x128xf32>
      %235 = vector.extract_strided_slice %223 {offsets = [0, 128], sizes = [1, 128], strides = [1, 1]} : vector<1x384xf32> to vector<1x128xf32>
      %236 = vector.extract_strided_slice %226 {offsets = [0, 128], sizes = [1, 128], strides = [1, 1]} : vector<1x384xf32> to vector<1x128xf32>
      %237 = arith.addf %235, %236 : vector<1x128xf32>
      %238 = arith.negf %237 : vector<1x128xf32>
      %239 = math.exp %238 : vector<1x128xf32>
      %cst_62 = arith.constant 1.000000e+00 : f32
      %240 = vector.broadcast %cst_62 : f32 to vector<1x128xf32>
      %241 = arith.addf %240, %239 : vector<1x128xf32>
      %242 = arith.divf %240, %241 : vector<1x128xf32>
      %243 = vector.extract_strided_slice %223 {offsets = [0, 256], sizes = [1, 128], strides = [1, 1]} : vector<1x384xf32> to vector<1x128xf32>
      %244 = vector.extract_strided_slice %226 {offsets = [0, 256], sizes = [1, 128], strides = [1, 1]} : vector<1x384xf32> to vector<1x128xf32>
      %245 = arith.mulf %234, %244 : vector<1x128xf32>
      %246 = arith.addf %243, %245 : vector<1x128xf32>
      %247 = math.tanh %246 : vector<1x128xf32>
      %cst_63 = arith.constant 1.000000e+00 : f32
      %248 = vector.broadcast %cst_63 : f32 to vector<1x128xf32>
      %249 = arith.subf %248, %242 : vector<1x128xf32>
      %250 = arith.mulf %249, %247 : vector<1x128xf32>
      %251 = arith.mulf %242, %222 : vector<1x128xf32>
      %252 = arith.addf %250, %251 : vector<1x128xf32>
      %253 = vector.extract_strided_slice %72 {offsets = [6, 0], sizes = [1, 384], strides = [1, 1]} : vector<8x384xf32> to vector<1x384xf32>
      %254 = arith.truncf %252 : vector<1x128xf32> to vector<1x128xbf16>
      %cst_64 = arith.constant dense<0.000000e+00> : vector<1x384xf32>
      %255 = tpu.matmul %254, %18, %cst_64 {dimension_numbers = #tpu.dot_dimension_numbers<[1], [0], [0], [1], [0, 0, 1, 1], [], []>} : vector<1x128xbf16>, vector<128x384xbf16>, vector<1x384xf32> -> vector<1x384xf32>
      %256 = arith.addf %255, %17 : vector<1x384xf32>
      %257 = vector.extract_strided_slice %253 {offsets = [0, 0], sizes = [1, 128], strides = [1, 1]} : vector<1x384xf32> to vector<1x128xf32>
      %258 = vector.extract_strided_slice %256 {offsets = [0, 0], sizes = [1, 128], strides = [1, 1]} : vector<1x384xf32> to vector<1x128xf32>
      %259 = arith.addf %257, %258 : vector<1x128xf32>
      %260 = arith.negf %259 : vector<1x128xf32>
      %261 = math.exp %260 : vector<1x128xf32>
      %cst_65 = arith.constant 1.000000e+00 : f32
      %262 = vector.broadcast %cst_65 : f32 to vector<1x128xf32>
      %263 = arith.addf %262, %261 : vector<1x128xf32>
      %264 = arith.divf %262, %263 : vector<1x128xf32>
      %265 = vector.extract_strided_slice %253 {offsets = [0, 128], sizes = [1, 128], strides = [1, 1]} : vector<1x384xf32> to vector<1x128xf32>
      %266 = vector.extract_strided_slice %256 {offsets = [0, 128], sizes = [1, 128], strides = [1, 1]} : vector<1x384xf32> to vector<1x128xf32>
      %267 = arith.addf %265, %266 : vector<1x128xf32>
      %268 = arith.negf %267 : vector<1x128xf32>
      %269 = math.exp %268 : vector<1x128xf32>
      %cst_66 = arith.constant 1.000000e+00 : f32
      %270 = vector.broadcast %cst_66 : f32 to vector<1x128xf32>
      %271 = arith.addf %270, %269 : vector<1x128xf32>
      %272 = arith.divf %270, %271 : vector<1x128xf32>
      %273 = vector.extract_strided_slice %253 {offsets = [0, 256], sizes = [1, 128], strides = [1, 1]} : vector<1x384xf32> to vector<1x128xf32>
      %274 = vector.extract_strided_slice %256 {offsets = [0, 256], sizes = [1, 128], strides = [1, 1]} : vector<1x384xf32> to vector<1x128xf32>
      %275 = arith.mulf %264, %274 : vector<1x128xf32>
      %276 = arith.addf %273, %275 : vector<1x128xf32>
      %277 = math.tanh %276 : vector<1x128xf32>
      %cst_67 = arith.constant 1.000000e+00 : f32
      %278 = vector.broadcast %cst_67 : f32 to vector<1x128xf32>
      %279 = arith.subf %278, %272 : vector<1x128xf32>
      %280 = arith.mulf %279, %277 : vector<1x128xf32>
      %281 = arith.mulf %272, %252 : vector<1x128xf32>
      %282 = arith.addf %280, %281 : vector<1x128xf32>
      %283 = vector.extract_strided_slice %72 {offsets = [7, 0], sizes = [1, 384], strides = [1, 1]} : vector<8x384xf32> to vector<1x384xf32>
      %284 = arith.truncf %282 : vector<1x128xf32> to vector<1x128xbf16>
      %cst_68 = arith.constant dense<0.000000e+00> : vector<1x384xf32>
      %285 = tpu.matmul %284, %18, %cst_68 {dimension_numbers = #tpu.dot_dimension_numbers<[1], [0], [0], [1], [0, 0, 1, 1], [], []>} : vector<1x128xbf16>, vector<128x384xbf16>, vector<1x384xf32> -> vector<1x384xf32>
      %286 = arith.addf %285, %17 : vector<1x384xf32>
      %287 = vector.extract_strided_slice %283 {offsets = [0, 0], sizes = [1, 128], strides = [1, 1]} : vector<1x384xf32> to vector<1x128xf32>
      %288 = vector.extract_strided_slice %286 {offsets = [0, 0], sizes = [1, 128], strides = [1, 1]} : vector<1x384xf32> to vector<1x128xf32>
      %289 = arith.addf %287, %288 : vector<1x128xf32>
      %290 = arith.negf %289 : vector<1x128xf32>
      %291 = math.exp %290 : vector<1x128xf32>
      %cst_69 = arith.constant 1.000000e+00 : f32
      %292 = vector.broadcast %cst_69 : f32 to vector<1x128xf32>
      %293 = arith.addf %292, %291 : vector<1x128xf32>
      %294 = arith.divf %292, %293 : vector<1x128xf32>
      %295 = vector.extract_strided_slice %283 {offsets = [0, 128], sizes = [1, 128], strides = [1, 1]} : vector<1x384xf32> to vector<1x128xf32>
      %296 = vector.extract_strided_slice %286 {offsets = [0, 128], sizes = [1, 128], strides = [1, 1]} : vector<1x384xf32> to vector<1x128xf32>
      %297 = arith.addf %295, %296 : vector<1x128xf32>
      %298 = arith.negf %297 : vector<1x128xf32>
      %299 = math.exp %298 : vector<1x128xf32>
      %cst_70 = arith.constant 1.000000e+00 : f32
      %300 = vector.broadcast %cst_70 : f32 to vector<1x128xf32>
      %301 = arith.addf %300, %299 : vector<1x128xf32>
      %302 = arith.divf %300, %301 : vector<1x128xf32>
      %303 = vector.extract_strided_slice %283 {offsets = [0, 256], sizes = [1, 128], strides = [1, 1]} : vector<1x384xf32> to vector<1x128xf32>
      %304 = vector.extract_strided_slice %286 {offsets = [0, 256], sizes = [1, 128], strides = [1, 1]} : vector<1x384xf32> to vector<1x128xf32>
      %305 = arith.mulf %294, %304 : vector<1x128xf32>
      %306 = arith.addf %303, %305 : vector<1x128xf32>
      %307 = math.tanh %306 : vector<1x128xf32>
      %cst_71 = arith.constant 1.000000e+00 : f32
      %308 = vector.broadcast %cst_71 : f32 to vector<1x128xf32>
      %309 = arith.subf %308, %302 : vector<1x128xf32>
      %310 = arith.mulf %309, %307 : vector<1x128xf32>
      %311 = arith.mulf %302, %282 : vector<1x128xf32>
      %312 = arith.addf %310, %311 : vector<1x128xf32>
      %313 = tpu.concatenate %102, %132, %162, %192, %222, %252, %282, %312 in 0 : vector<1x128xf32>, vector<1x128xf32>, vector<1x128xf32>, vector<1x128xf32>, vector<1x128xf32>, vector<1x128xf32>, vector<1x128xf32>, vector<1x128xf32> -> vector<8x128xf32>
      %314 = arith.index_cast %70 : i32 to index
      %c0_72 = arith.constant 0 : index
      %315 = vector.load %arg7[%314, %c0_72] : memref<16x128xf32, #tpu.memory_space<vmem>>, vector<8x128xf32>
      tpu.vector_store %arg7[%314, %c0_72], %313 {strides = array<i32>} : memref<16x128xf32, #tpu.memory_space<vmem>>, vector<8x128xf32>,
      scf.yield %312 : vector<1x128xf32>
    }
    %c2_i32_38 = arith.constant 2 : i32
    return
  }
}

</mosaic_0001>

<bundles_post_ra>
// kernel: tpu_custom_call.1
= control target key start
LH: loop header
LB: loop body
LE: loop exit
PB: predicated region body
PF: predicated region fallthrough
CT: control target
= control target key end

     0   :  { %12 = vsyncpa [#allocation7], 0  ;;  %s4415_s0 = inlined_call_operand.hbm [shape: f32[16,128], index: 0, kind: input, shape index: {}]   ;;  %s4416_s1 = inlined_call_operand.hbm [shape: bf16[128,640], index: 1, kind: input, shape index: {}]   ;;  %s4417_s2 = inlined_call_operand.vmem [shape: f32[1,640], index: 2, kind: input, shape index: {}]   ;;  %s4418_s3 = inlined_call_operand.vmem [shape: f32[1,128], index: 3, kind: input, shape index: {}]   ;;  %s4419_s4 = inlined_call_operand.hbm [shape: bf16[128,384], index: 4, kind: input, shape index: {}]   ;;  %s4420_s5 = inlined_call_operand.hbm [shape: bf16[128,384], index: 5, kind: input, shape index: {}]   ;;  %s4421_s6 = inlined_call_operand.vmem [shape: f32[1,384], index: 6, kind: input, shape index: {}]   ;;  %s4422_s7 = inlined_call_operand.hbm [shape: f32[16,128], index: 7, kind: output, shape index: {}]  }
   0x1   :  { %13 = vsyncpa [#allocation10], 0 }
   0x2   :  { %14 = vsyncpa [#allocation13], 0 }
   0x3   :  { %15 = vsyncpa [#allocation8], 0  ;;  %s3416_s24 = smov [#allocation9]   ;;  %s3282_s28 = scalar_lea.hbm %s4416_s1, 5120 }
   0x4   :  { %s33_s25 = sshll.u32 %s3416_s24, 4  ;;  %p3283_p0 = scmp.ne.s32.totalorder %s4416_s1, %s3282_s28  ;;  %s34_s25 = int_to_ptr.vmem [resolvable:$true] %s33_s25 }
   0x5   :  { %p3286_p1 = scmp.lt.u32.totalorder %s3282_s28, %s4416_s1 }
   0x7   :  { %p3288_p2 = pnand %p3286_p1, %p3283_p0 }
   0x9   :  { %3291 = shalt.err (!%p3288_p2)
}
   0xa   :  { %s3292_s10 = scalar_lea.vmem %s34_s25, 5120  ;;  %p3297_p4 = scmp.lt.s32.totalorder %s34_s25, %s34_s25 }
   0xb   :  { %p3293_p3 = scmp.ne.s32.totalorder %s34_s25, %s3292_s10  ;;  %p3298_p5 = scmp.lt.s32.totalorder %s3292_s10, %s3292_s10 }
   0xd   :  { %p3299_p6 = por %p3298_p5, %p3297_p4 }
   0xf   :  { %p3300_p7 = pnand %p3299_p6, %p3293_p3 }
  0x11   :  { %3303 = shalt.err (!%p3300_p7)
}
  0x12   :  { %s3417_s11 = smov 320   ;;  %s3418_s12 = smov 20  }
  0x13   :  { %39 = dma.hbm_to_vmem [thread:$0]  %s4416_s1, 5120, %s34_s25, [#allocation10], %s3417_s11, %s3417_s11, %s3418_s12  }
  0x14   :  { %s3419_s15 = smov [#allocation6]   ;;  %s3304_s19 = scalar_lea.hbm %s4415_s0, 256 }
  0x15   :  { %s21_s16 = sshll.u32 %s3419_s15, 4  ;;  %p3305_p8 = scmp.ne.s32.totalorder %s4415_s0, %s3304_s19  ;;  %s22_s16 = int_to_ptr.vmem [resolvable:$true] %s21_s16 }
  0x16   :  { %p3308_p9 = scmp.lt.u32.totalorder %s3304_s19, %s4415_s0 }
  0x18   :  { %p3310_p10 = pnand %p3308_p9, %p3305_p8 }
  0x1a   :  { %3313 = shalt.err (!%p3310_p10)
}
  0x1b   :  { %s3314_s24 = scalar_lea.vmem %s22_s16, 256  ;;  %p3319_p12 = scmp.lt.s32.totalorder %s22_s16, %s22_s16 }
  0x1c   :  { %p3315_p11 = scmp.ne.s32.totalorder %s22_s16, %s3314_s24  ;;  %p3320_p13 = scmp.lt.s32.totalorder %s3314_s24, %s3314_s24 }
  0x1e   :  { %p3321_p0 = por %p3320_p13, %p3319_p12 }
  0x20   :  { %p3322_p1 = pnand %p3321_p0, %p3315_p11 }
  0x22   :  { %3325 = shalt.err (!%p3322_p1)
}
  0x23   :  { %s3420_s1 = smov 128   ;;  %s3421_s25 = smov 8  }
  0x24   :  { %27 = dma.hbm_to_vmem [thread:$0]  %s4415_s0, 256, %s22_s16, [#allocation7], %s3420_s1, %s3420_s1, %s3421_s25  }
  0x25   :  { %s3422_s28 = smov [#allocation11]   ;;  %s3326_s9 = scalar_lea.hbm %s4419_s4, 3072 }
  0x26   :  { %s49_s29 = sshll.u32 %s3422_s28, 4  ;;  %p3327_p2 = scmp.ne.s32.totalorder %s4419_s4, %s3326_s9  ;;  %s50_s29 = int_to_ptr.vmem [resolvable:$true] %s49_s29 }
  0x27   :  { %p3330_p3 = scmp.lt.u32.totalorder %s3326_s9, %s4419_s4 }
  0x29   :  { %p3332_p4 = pnand %p3330_p3, %p3327_p2 }
  0x2b   :  { %3335 = shalt.err (!%p3332_p4)
}
  0x2c   :  { %s3336_s14 = scalar_lea.vmem %s50_s29, 3072  ;;  %p3341_p6 = scmp.lt.s32.totalorder %s50_s29, %s50_s29 }
  0x2d   :  { %p3337_p5 = scmp.ne.s32.totalorder %s50_s29, %s3336_s14  ;;  %p3342_p7 = scmp.lt.s32.totalorder %s3336_s14, %s3336_s14 }
  0x2f   :  { %p3343_p8 = por %p3342_p7, %p3341_p6 }
  0x31   :  { %p3344_p9 = pnand %p3343_p8, %p3337_p5 }
  0x33   :  { %3347 = shalt.err (!%p3344_p9)
}
  0x34   :  { %s3423_s0 = smov 192   ;;  %s3424_s15 = smov 12  }
  0x35   :  { %55 = dma.hbm_to_vmem [thread:$0]  %s4419_s4, 3072, %s50_s29, [#allocation10], %s3423_s0, %s3423_s0, %s3424_s15  }
  0x36   :  { %s3425_s18 = smov [#allocation12]   ;;  %s3348_s22 = scalar_lea.hbm %s4420_s5, 3072 }
  0x37   :  { %s61_s19 = sshll.u32 %s3425_s18, 4  ;;  %p3349_p10 = scmp.ne.s32.totalorder %s4420_s5, %s3348_s22  ;;  %s62_s19 = int_to_ptr.vmem [resolvable:$true] %s61_s19 }
  0x38   :  { %p3352_p11 = scmp.lt.u32.totalorder %s3348_s22, %s4420_s5 }
  0x3a   :  { %p3354_p12 = pnand %p3352_p11, %p3349_p10 }
  0x3c   :  { %3357 = shalt.err (!%p3354_p12)
}
  0x3d   :  { %s3358_s28 = scalar_lea.vmem %s62_s19, 3072  ;;  %p3363_p0 = scmp.lt.s32.totalorder %s62_s19, %s62_s19 }
  0x3e   :  { %p3359_p13 = scmp.ne.s32.totalorder %s62_s19, %s3358_s28  ;;  %p3364_p1 = scmp.lt.s32.totalorder %s3358_s28, %s3358_s28 }
  0x40   :  { %p3365_p2 = por %p3364_p1, %p3363_p0 }
  0x42   :  { %p3366_p3 = pnand %p3365_p2, %p3359_p13 }
  0x44   :  { %3369 = shalt.err (!%p3366_p3)
}
  0x45   :  { %67 = dma.hbm_to_vmem [thread:$0]  %s4420_s5, 3072, %s62_s19, [#allocation13], %s3423_s0, %s3423_s0, %s3424_s15  }
  0x46   :  { %3400 = dma.done.wait [#allocation7], 256  }
  0x47   :  { %3401 = vsyncadd [#allocation7], 4294967040 }
  0x48   :  { %3402 = dma.done.wait [#allocation10], 8192  }
  0x49   :  { %3403 = vsyncadd [#allocation10], 4294959104 }
  0x4a   :  { %3404 = dma.done.wait [#allocation13], 3072  }
  0x4b   :  { %3405 = vsyncadd [#allocation13], 4294964224  ;;  %v4424_v0 = vmov 0   ;;  %v3530_v1 = vld [vmem:[%s4421_s6] sm:$0x7]  ;;  %v3536_v4 = vld [vmem:[#allocation12 + $0xc] sm:$0xff]  ;;  %v4425_v53 = vlaneseq }
  0x4c   :  { %402 = vmatprep.mubr.bf16.mxu0 %v4424_v0  ;;  %445 = vmatprep.mubr.bf16.mxu1 %v4424_v0  ;;  %4445 = vst [vmem:[#allocation19_spill] sm:$0xff] %v3530_v1  ;;  %v3532_v2 = vld [vmem:[#allocation12] sm:$0xff]  ;;  %v3534_v3 = vld [vmem:[#allocation12 + $0x8] sm:$0xf]  ;;  %4448 = vst [vmem:[#allocation22_spill] sm:$0xff] %v3536_v4  ;;  %vm963_vm0 = vcmask 130112  }
  0x4d   :  { %4446 = vst [vmem:[#allocation20_spill] sm:$0xff] %v3532_v2  ;;  %4447 = vst [vmem:[#allocation21_spill] sm:$0xff] %v3534_v3  ;;  %v3538_v5 = vld [vmem:[#allocation12 + $0x14] sm:$0xf]  ;;  %v3540_v6 = vld [vmem:[#allocation12 + $0x18] sm:$0xff]  ;;  %v3600_v54 = vshrl.u32 %v4425_v53, 7 }
  0x4e   :  { %4449 = vst [vmem:[#allocation23_spill] sm:$0xff] %v3538_v5  ;;  %4450 = vst [vmem:[#allocation24_spill] sm:$0xff] %v3540_v6  ;;  %v3542_v7 = vld [vmem:[#allocation12 + $0x20] sm:$0xf]  ;;  %v3544_v8 = vld [vmem:[#allocation12 + $0x24] sm:$0xff]  ;;  %vm1100_vm1 = vcmask 1041409  }
  0x4f   :  { %4451 = vst [vmem:[#allocation25_spill] sm:$0xff] %v3542_v7  ;;  %4452 = vst [vmem:[#allocation26_spill] sm:$0xff] %v3544_v8  ;;  %v3546_v9 = vld [vmem:[#allocation12 + $0x2c] sm:$0xf]  ;;  %v3548_v10 = vld [vmem:[#allocation12 + $0x30] sm:$0xff]  ;;  %v3603_v57 = vsub.s32 0, %v3600_v54 }
  0x50   :  { %4453 = vst [vmem:[#allocation27_spill] sm:$0xff] %v3546_v9  ;;  %4454 = vst [vmem:[#allocation28_spill] sm:$0xff] %v3548_v10  ;;  %v3550_v11 = vld [vmem:[#allocation12 + $0x38] sm:$0xf]  ;;  %v3552_v12 = vld [vmem:[#allocation12 + $0x3c] sm:$0xff]  ;;  %v4423_v61 = vsub.s32 1, %v3600_v54 }
  0x51   :  { %4455 = vst [vmem:[#allocation29_spill] sm:$0xff] %v3550_v11  ;;  %4456 = vst [vmem:[#allocation30_spill] sm:$0xff] %v3552_v12  ;;  %v3554_v13 = vld [vmem:[#allocation12 + $0x44] sm:$0xf]  ;;  %v3556_v14 = vld [vmem:[#allocation12 + $0x48] sm:$0xff]  ;;  %vm1102_vm2 = vcmask 1042434  }
  0x52   :  { %4457 = vst [vmem:[#allocation31_spill] sm:$0xff] %v3554_v13  ;;  %4458 = vst [vmem:[#allocation32_spill] sm:$0xff] %v3556_v14  ;;  %v3558_v15 = vld [vmem:[#allocation12 + $0x50] sm:$0xf]  ;;  %v3560_v16 = vld [vmem:[#allocation12 + $0x54] sm:$0xff]  ;;  %vm1104_vm3 = vcmask 1043459  }
  0x53   :  { %4459 = vst [vmem:[#allocation33_spill] sm:$0xff] %v3558_v15  ;;  %v3562_v17 = vld [vmem:[#allocation12 + $0x5c] sm:$0xf]  ;;  %v3564_v18 = vld [vmem:[#allocation12 + $0x60] sm:$0xff]  ;;  %v3566_v19 = vld [vmem:[#allocation12 + $0x68] sm:$0xf] }
  0x54   :  { %4460 = vst [vmem:[#allocation34_spill] sm:$0xff] %v3566_v19  ;;  %v3568_v20 = vld [vmem:[#allocation12 + $0x6c] sm:$0xff]  ;;  %v3570_v21 = vld [vmem:[#allocation12 + $0x74] sm:$0xf]  ;;  %v3572_v22 = vld [vmem:[#allocation12 + $0x78] sm:$0xff]  ;;  %vm1106_vm5 = vcmask 1044484  }
  0x55   :  { %4461 = vst [vmem:[#allocation35_spill] sm:$0xff] %v3570_v21  ;;  %4462 = vst [vmem:[#allocation36_spill] sm:$0xff] %v3572_v22  ;;  %v3574_v23 = vld [vmem:[#allocation12 + $0x80] sm:$0xf]  ;;  %v3576_v24 = vld [vmem:[#allocation12 + $0x84] sm:$0xff]  ;;  %vm1108_vm6 = vcmask 1045509  }
  0x56   :  { %4463 = vst [vmem:[#allocation37_spill] sm:$0xff] %v3574_v23  ;;  %v3578_v25 = vld [vmem:[#allocation12 + $0x8c] sm:$0xf]  ;;  %v3580_v26 = vld [vmem:[#allocation12 + $0x90] sm:$0xff]  ;;  %v3582_v27 = vld [vmem:[#allocation12 + $0x98] sm:$0xf] }
  0x57   :  { %4464 = vst [vmem:[#allocation38_spill] sm:$0xff] %v3578_v25  ;;  %4465 = vst [vmem:[#allocation39_spill] sm:$0xff] %v3580_v26  ;;  %v3584_v28 = vld [vmem:[#allocation12 + $0x9c] sm:$0xff]  ;;  %v3586_v29 = vld [vmem:[#allocation12 + $0xa4] sm:$0xf]  ;;  %vm1110_vm8 = vcmask 1046534  }
  0x58   :  { %4466 = vst [vmem:[#allocation40_spill] sm:$0xff] %v3582_v27  ;;  %4467 = vst [vmem:[#allocation41_spill] sm:$0xff] %v3584_v28  ;;  %v3588_v30 = vld [vmem:[#allocation12 + $0xa8] sm:$0xff]  ;;  %v3590_v31 = vld [vmem:[#allocation12 + $0xb0] sm:$0xf]  ;;  %vm1112_vm9 = vcmask 1047559  }
  0x59   :  { %4468 = vst [vmem:[#allocation42_spill] sm:$0xff] %v3586_v29  ;;  %4469 = vst [vmem:[#allocation43_spill] sm:$0xff] %v3588_v30  ;;  %v3592_v32 = vld [vmem:[#allocation12 + $0xb4] sm:$0xff]  ;;  %v3594_v33 = vld [vmem:[#allocation12 + $0xbc] sm:$0xf]  ;;  %vm1125_vm10 = vcmask 130048  }
  0x5a   :  { %4470 = vst [vmem:[#allocation44_spill] sm:$0xff] %v3590_v31  ;;  %4471 = vst [vmem:[#allocation45_spill] sm:$0xff] %v3592_v32  ;;  %v3072_v34 = vld [vmem:[#allocation9 + $0x4] ss:$20 sps:$4 sm:$0xff]   ;;  %v3074_v35 = vld [vmem:[#allocation9] ss:$20 sps:$4 sm:$0xff]  }
  0x5b   :  { %4472 = vst [vmem:[#allocation46_spill] sm:$0xff] %v3594_v33  ;;  %370 = vmatprep.subr.bf16.mxu0 %v3072_v34  ;;  %v3075_v36 = vld [vmem:[#allocation9 + $0x2c] ss:$20 sps:$4 sm:$0xff]   ;;  %v3077_v37 = vld [vmem:[#allocation9 + $0x28] ss:$20 sps:$4 sm:$0xff]   ;;  %v83_v50 = vld [vmem:[#allocation6] sm:$0xff] }
  0x5c   :  { %371 = vmatpush1.bf16.msra.mxu0 %v3074_v35  ;;  %v3078_v38 = vld [vmem:[#allocation9 + $0x54] ss:$20 sps:$4 sm:$0xff]   ;;  %v3080_v39 = vld [vmem:[#allocation9 + $0x50] ss:$20 sps:$4 sm:$0xff]   ;;  %v3083_v41 = vld [vmem:[#allocation9 + $0x78] ss:$20 sps:$4 sm:$0xff]  }
  0x5d   :  { %372 = vmatprep.subr.bf16.mxu0 %v3075_v36  ;;  %v3081_v40 = vld [vmem:[#allocation9 + $0x7c] ss:$20 sps:$4 sm:$0xff]   ;;  %v3084_v42 = vld [vmem:[#allocation9 + $0xa4] ss:$20 sps:$4 sm:$0xff]   ;;  %v3086_v43 = vld [vmem:[#allocation9 + $0xa0] ss:$20 sps:$4 sm:$0xff]  }
  0x5e   :  { %v3087_v44 = vld [vmem:[#allocation9 + $0xcc] ss:$20 sps:$4 sm:$0xff]   ;;  %v3089_v45 = vld [vmem:[#allocation9 + $0xc8] ss:$20 sps:$4 sm:$0xff]   ;;  %v3092_v47 = vld [vmem:[#allocation9 + $0xf0] ss:$20 sps:$4 sm:$0xff]  }
  0x5f   :  { %v3090_v46 = vld [vmem:[#allocation9 + $0xf4] ss:$20 sps:$4 sm:$0xff]   ;;  %v3093_v48 = vld [vmem:[#allocation9 + $0x11c] ss:$20 sps:$4 sm:$0xff]   ;;  %v3095_v49 = vld [vmem:[#allocation9 + $0x118] ss:$20 sps:$4 sm:$0xff]  }
  0x60   :  { %373 = vmatpush1.bf16.msra.mxu0 %v3077_v37  ;;  %v84_v51 = vld [vmem:[#allocation6 + $0x8] sm:$0xff]  ;;  %v3427_v55 = vmov 1966171168   ;;  %v3608_v58 = vld [vmem:[%s4417_s2] sm:$0x1f]  ;;  %vm3429_vm14 = vmmov 0  }
  0x61   :  { %374 = vmatprep.subr.bf16.mxu0 %v3078_v38  ;;  %v3596_v52 = vpack.c.bf16 %v84_v51, %v83_v50  ;;  %v550_v56 = vunpack.c.l.s4 %v3427_v55  ;;  %v140_v60 = vrot.slane %v3608_v58, %v3603_v57  ;;  %v144_v36 = vrot.slane %v3608_v58, %v4423_v61 }
  0x63   :  { %v551_v59 = vunpack.c.0.s8 %v550_v56 }
  0x64   :  { %375 = vmatpush1.bf16.msra.mxu0 %v3080_v39 }
  0x65   :  { %376 = vmatprep.subr.bf16.mxu0 %v3081_v40  ;;  %v554_v62 = vsub.s32 %v551_v59, %v3600_v54 }
  0x68   :  { %377 = vmatpush1.bf16.msra.mxu0 %v3083_v41 }
  0x69   :  { %378 = vmatprep.subr.bf16.mxu0 %v3084_v42  ;;  %v507_v42 = vld [vmem:[%s4418_s3] sm:$0x1]  ;;  %s3882_s3 = smov 0  }
  0x6c   :  { %379 = vmatpush1.bf16.msra.mxu0 %v3086_v43 }
  0x6d   :  { %380 = vmatprep.subr.bf16.mxu0 %v3087_v44 }
  0x70   :  { %381 = vmatpush1.bf16.msra.mxu0 %v3089_v45 }
  0x71   :  { %382 = vmatprep.subr.bf16.mxu0 %v3090_v46 }
  0x74   :  { %383 = vmatpush1.bf16.msra.mxu0 %v3092_v47 }
  0x75   :  { %384 = vmatprep.subr.bf16.mxu0 %v3093_v48 }
  0x78   :  { %385 = vmatpush1.bf16.msra.mxu0 %v3095_v49  ;;  %v3622_v49 = vpack.c.bf16 %v507_v42, %v507_v42 }
  0x7b   :  { %403 = vmatmul.mubr.bf16.vlgmr.msra.gmra.mrb[0].mxu0 %v3596_v52 }
 0x14e   :  { %v404_v63 = vpop.f32.mrb[0].mxu0 }
 0x14f   :  { %v405_v34 = vadd.f32 %v404_v63, %v140_v60  ;;  %v406_v35 = vpop.f32.mrb[1].mxu0 }
 0x150   :  { %v408_v37 = vpop.f32.mrb[2].mxu0  ;;  %v3620_v47 = vadd.f32 %v406_v35, %v144_v36 }
 0x151   :  { %v548_v38 = vcombine.high %v405_v34, %v405_v34  ;;  %v555_v39 = vrot.slane %v405_v34, %v554_v62  ;;  %v409_v40 = vadd.f32 %v408_v37, %v140_v60  ;;  %v410_v41 = vpop.f32.mrb[3].mxu0 }
 0x152   :  { %v3624_v34 = vadd.f32 %v410_v41, %v144_v36 }
 0x153   :  { %v562_v43 = vrot.slane %v548_v38, %v554_v62  ;;  %v563_v44 = vcombine.high %v555_v39, %v555_v39  ;;  %v571_v45 = vrot.slane %v555_v39, %v554_v62  ;;  %v597_v46 = vcombine.high %v409_v40, %v409_v40 }
 0x154   :  { %v604_v48 = vrot.slane %v409_v40, %v554_v62 }
 0x155   :  { %v564_v50 = vcombine.high %v562_v43, %v562_v43  ;;  %v578_v51 = vrot.slane %v562_v43, %v554_v62  ;;  %v585_v55 = vrot.slane %v563_v44, %v554_v62  ;;  %v593_v56 = vcombine.high %v571_v45, %v571_v45 }
 0x156   :  { %v611_v59 = vrot.slane %v597_v46, %v554_v62  ;;  %v612_v60 = vcombine.high %v604_v48, %v604_v48  ;;  %v620_v63 = vrot.slane %v604_v48, %v554_v62  ;;  %v649_v39 = vrot.slane %v571_v45, %v3603_v57 }
 0x157   :  { %v592_v37 = vrot.slane %v564_v50, %v554_v62  ;;  %v594_v61 = vcombine.high %v578_v51, %v578_v51  ;;  %v595_v38 = vcombine.high %v585_v55, %v585_v55  ;;  %v653_v35 = vrot.slane %v585_v55, %v3603_v57 }
 0x158   :  { %v657_v40 = vrot.slane %v593_v56, %v3603_v57  ;;  %v613_v42 = vcombine.high %v611_v59, %v611_v59  ;;  %v627_v0 = vrot.slane %v611_v59, %v554_v62  ;;  %v665_v44 = vrot.slane %v578_v51, %v3603_v57 }
 0x159   :  { %v596_v53 = vcombine.high %v592_v37, %v592_v37  ;;  %v661_v43 = vrot.slane %v595_v38, %v3603_v57  ;;  %v669_v46 = vrot.slane %v592_v37, %v3603_v57  ;;  %v634_v36 = vrot.slane %v612_v60, %v554_v62 }
 0x15a   :  { %v641_v41 = vrot.slane %v613_v42, %v554_v62  ;;  %v642_v48 = vcombine.high %v620_v63, %v620_v63  ;;  %v643_v50 = vcombine.high %v627_v0, %v627_v0  ;;  %v673_v1 = vrot.slane %v594_v61, %v3603_v57 }
 0x15b   :  { %v681_v45 = vrot.slane %v620_v63, %v3603_v57  ;;  %v697_v55 = vrot.slane %v627_v0, %v3603_v57  ;;  %v726_v56 = vadd.f32 %v649_v39, %v3620_v47  ;;  %v644_v59 = vcombine.high %v634_v36, %v634_v36 }
 0x15c   :  { %v645_v31 = vcombine.high %v641_v41, %v641_v41  ;;  %v685_v38 = vrot.slane %v634_v36, %v3603_v57  ;;  %v689_v51 = vrot.slane %v642_v48, %v3603_v57  ;;  %v701_v37 = vrot.slane %v641_v41, %v3603_v57 }
 0x15d   :  { %v705_v62 = vrot.slane %v643_v50, %v3603_v57  ;;  %v742_v60 = vadd.f32 %v681_v45, %v3620_v47  ;;  %v3642_v61 = vadd.f32 %v697_v55, %v3620_v47  ;;  %v693_v63 = vrot.slane %v644_v59, %v3603_v57 }
 0x15e   :  { %v709_v0 = vrot.slane %v645_v31, %v3603_v57  ;;  %v744_v42 = vadd.f32 %v685_v38, %v3620_v47  ;;  %v3648_v33 = vadd.f32 %v689_v51, %v3620_v47  ;;  %v3651_v36 = vadd.f32 %v701_v37, %v3620_v47 }
 0x15f   :  { %v3654_v41 = vadd.f32 %v705_v62, %v3620_v47  ;;  %v727_v48 = vadd.f32 %v649_v39, %v3624_v34  ;;  %v728_v50 = vadd.f32 %v653_v35, %v3620_v47  ;;  %v3659_v27 = vadd.f32 %v693_v63, %v3620_v47 }
 0x160   :  { %v3662_v31 = vadd.f32 %v709_v0, %v3620_v47  ;;  %v729_v59 = vadd.f32 %v653_v35, %v3624_v34  ;;  %v743_v29 = vadd.f32 %v681_v45, %v3624_v34  ;;  %v730_v32 = vadd.f32 %v657_v40, %v3620_v47 }
 0x161   :  { %v758_v30 = vpack.c.bf16 %v727_v48, %v726_v56  ;;  %v731_v23 = vadd.f32 %v657_v40, %v3624_v34  ;;  %v734_v25 = vadd.f32 %v665_v44, %v3620_v47  ;;  %v735_v28 = vadd.f32 %v665_v44, %v3624_v34 }
 0x162   :  { %v759_v39 = vpack.c.bf16 %v729_v59, %v728_v50  ;;  %v766_v26 = vpack.c.bf16 %v743_v29, %v742_v60  ;;  %v745_v19 = vadd.f32 %v685_v38, %v3624_v34  ;;  %v747_v22 = vadd.f32 %v689_v51, %v3624_v34 }
 0x163   :  { %3160 = vtanh.bf16 %v758_v30  ;;  %v760_v21 = vpack.c.bf16 %v731_v23, %v730_v32  ;;  %v732_v35 = vadd.f32 %v661_v43, %v3620_v47  ;;  %v762_v45 = vpack.c.bf16 %v735_v28, %v734_v25 }
 0x164   :  { %3162 = vtanh.bf16 %v759_v39  ;;  %v767_v56 = vpack.c.bf16 %v745_v19, %v744_v42  ;;  %v733_v48 = vadd.f32 %v661_v43, %v3624_v34  ;;  %v677_v40 = vrot.slane %v596_v53, %v3603_v57 }
 0x165   :  { %v768_v50 = vpack.c.bf16 %v747_v22, %v3648_v33  ;;  %v751_v29 = vadd.f32 %v697_v55, %v3624_v34  ;;  %v736_v44 = vadd.f32 %v669_v46, %v3620_v47  ;;  %v791_v23 = vpack.i.b16 %v3622_v49, %v3622_v49 }
 0x166   :  { %v761_v30 = vpack.c.bf16 %v733_v48, %v732_v35  ;;  %v737_v32 = vadd.f32 %v669_v46, %v3624_v34  ;;  %v3682_v38 = vadd.f32 %v673_v1, %v3620_v47  ;;  %3164 = vtanh.bf16 %v766_v26 }
 0x167   :  { %v770_v19 = vpack.c.bf16 %v751_v29, %v3642_v61  ;;  %v739_v25 = vadd.f32 %v673_v1, %v3624_v34  ;;  %v3687_v22 = vadd.f32 %v693_v63, %v3624_v34  ;;  %v3690_v33 = vadd.f32 %v701_v37, %v3624_v34 }
 0x168   :  { %v763_v28 = vpack.c.bf16 %v737_v32, %v736_v44  ;;  %v3693_v53 = vadd.f32 %v705_v62, %v3624_v34  ;;  %v3699_v26 = vadd.f32 %v677_v40, %v3620_v47  ;;  %v3706_v55 = vadd.f32 %v677_v40, %v3624_v34 }
 0x169   :  { %v764_v49 = vpack.c.bf16 %v739_v25, %v3682_v38  ;;  %v769_v43 = vpack.c.bf16 %v3687_v22, %v3659_v27  ;;  %v771_v1 = vpack.c.bf16 %v3690_v33, %v3651_v36  ;;  %v3709_v51 = vrot.slane %v791_v23, %v3603_v57 }
 0x16a   :  { %v772_v46 = vpack.c.bf16 %v3693_v53, %v3654_v41  ;;  %3166 = vtanh.bf16 %v760_v21  ;;  %v3712_v37 = vadd.f32 %v709_v0, %v3624_v34  ;;  %v765_v27 = vpack.c.bf16 %v3706_v55, %v3699_v26 }
 0x16b   :  { %3168 = vtanh.bf16 %v762_v45 }
 0x16c   :  { %v773_v47 = vpack.c.bf16 %v3712_v37, %v3662_v31  ;;  %3170 = vtanh.bf16 %v767_v56 }
 0x16d   :  { %3172 = vtanh.bf16 %v768_v50 }
 0x16e   :  { %v3161_v62 = vpop.eup %3160  ;;  %3174 = vtanh.bf16 %v761_v30 }
 0x16f   :  { %v3163_v60 = vpop.eup %3162  ;;  %v797_v61 = vmul.bf16 %v3161_v62, %v3709_v51  ;;  %3176 = vtanh.bf16 %v770_v19 }
 0x170   :  { %v798_v63 = vmul.bf16 %v3163_v60, %v3709_v51  ;;  %3178 = vtanh.bf16 %v763_v28 }
 0x171   :  { %v813_v42 = vunpack.c.l.bf16 %v797_v61  ;;  %v3165_v59 = vpop.eup %3164  ;;  %v814_v21 = vunpack.c.h.bf16 %v797_v61  ;;  %3180 = vtanh.bf16 %v764_v49 }
 0x172   :  { %v815_v39 = vunpack.c.l.bf16 %v798_v63  ;;  %v805_v34 = vmul.bf16 %v3165_v59, %v3709_v51  ;;  %v816_v35 = vunpack.c.h.bf16 %v798_v63  ;;  %3182 = vtanh.bf16 %v769_v43 }
 0x173   :  { %845 = vadd.xlane.f32.xlu0 %v813_v42  ;;  %3184 = vtanh.bf16 %v771_v1 }
 0x174   :  { %849 = vadd.xlane.f32.xlu1 %v815_v39  ;;  %v829_v48 = vunpack.c.l.bf16 %v805_v34  ;;  %v830_v29 = vunpack.c.h.bf16 %v805_v34  ;;  %3186 = vtanh.bf16 %v772_v46 }
 0x175   :  { %v3167_v0 = vpop.eup %3166  ;;  %3188 = vtanh.bf16 %v765_v27 }
 0x176   :  { %v799_v40 = vmul.bf16 %v3167_v0, %v3709_v51  ;;  %v3169_v45 = vpop.eup %3168  ;;  %3190 = vtanh.bf16 %v773_v47 }
 0x177   :  { %847 = vadd.xlane.f32.xlu0 %v814_v21  ;;  %v801_v56 = vmul.bf16 %v3169_v45, %v3709_v51  ;;  %v3171_v23 = vpop.eup %3170 }
 0x178   :  { %851 = vadd.xlane.f32.xlu1 %v816_v35  ;;  %v817_v44 = vunpack.c.l.bf16 %v799_v40  ;;  %v818_v32 = vunpack.c.h.bf16 %v799_v40  ;;  %v806_v50 = vmul.bf16 %v3171_v23, %v3709_v51  ;;  %v3173_v25 = vpop.eup %3172 }
 0x179   :  { %v821_v38 = vunpack.c.l.bf16 %v801_v56  ;;  %v822_v22 = vunpack.c.h.bf16 %v801_v56  ;;  %v807_v30 = vmul.bf16 %v3173_v25, %v3709_v51  ;;  %v3175_v60 = vpop.eup %3174 }
 0x17a   :  { %v831_v62 = vunpack.c.l.bf16 %v806_v50  ;;  %v832_v61 = vunpack.c.h.bf16 %v806_v50  ;;  %v800_v19 = vmul.bf16 %v3175_v60, %v3709_v51  ;;  %v3177_v42 = vpop.eup %3176 }
 0x17b   :  { %877 = vadd.xlane.f32.xlu0 %v829_v48  ;;  %v833_v63 = vunpack.c.l.bf16 %v807_v30  ;;  %v834_v59 = vunpack.c.h.bf16 %v807_v30  ;;  %v809_v28 = vmul.bf16 %v3177_v42, %v3709_v51  ;;  %v3179_v21 = vpop.eup %3178 }
 0x17c   :  { %879 = vadd.xlane.f32.xlu1 %v830_v29  ;;  %v819_v39 = vunpack.c.l.bf16 %v800_v19  ;;  %v820_v34 = vunpack.c.h.bf16 %v800_v19  ;;  %v802_v0 = vmul.bf16 %v3179_v21, %v3709_v51  ;;  %v3181_v35 = vpop.eup %3180 }
 0x17d   :  { %v837_v49 = vunpack.c.l.bf16 %v809_v28  ;;  %v838_v48 = vunpack.c.h.bf16 %v809_v28  ;;  %v803_v40 = vmul.bf16 %v3181_v35, %v3709_v51  ;;  %v3183_v45 = vpop.eup %3182 }
 0x17e   :  { %v823_v43 = vunpack.c.l.bf16 %v802_v0  ;;  %v824_v29 = vunpack.c.h.bf16 %v802_v0  ;;  %v808_v33 = vmul.bf16 %v3183_v45, %v3709_v51  ;;  %v3185_v1 = vpop.eup %3184  ;;  %v4473_v45 = vlaneseq }
 0x17f   :  { %853 = vadd.xlane.f32.xlu0 %v817_v44  ;;  %v825_v36 = vunpack.c.l.bf16 %v803_v40  ;;  %v826_v44 = vunpack.c.h.bf16 %v803_v40  ;;  %v810_v53 = vmul.bf16 %v3185_v1, %v3709_v51  ;;  %v3187_v46 = vpop.eup %3186 }
 0x180   :  { %855 = vadd.xlane.f32.xlu1 %v818_v32  ;;  %v835_v41 = vunpack.c.l.bf16 %v808_v33  ;;  %v836_v56 = vunpack.c.h.bf16 %v808_v33  ;;  %v811_v55 = vmul.bf16 %v3187_v46, %v3709_v51  ;;  %v3189_v27 = vpop.eup %3188 }
 0x181   :  { %v839_v26 = vunpack.c.l.bf16 %v810_v53  ;;  %v840_v23 = vunpack.c.h.bf16 %v810_v53  ;;  %v3191_v31 = vpop.eup %3190 }
 0x182   :  { %v841_v32 = vunpack.c.l.bf16 %v811_v55  ;;  %v842_v37 = vunpack.c.h.bf16 %v811_v55  ;;  %v812_v50 = vmul.bf16 %v3191_v31, %v3709_v51 }
 0x183   :  { %861 = vadd.xlane.f32.xlu0 %v821_v38  ;;  %v804_v38 = vmul.bf16 %v3189_v27, %v3709_v51 }
 0x184   :  { %863 = vadd.xlane.f32.xlu1 %v822_v22  ;;  %v843_v22 = vunpack.c.l.bf16 %v812_v50 }
 0x185   :  { %v827_v47 = vunpack.c.l.bf16 %v804_v38  ;;  %v828_v25 = vunpack.c.h.bf16 %v804_v38 }
 0x187   :  { %881 = vadd.xlane.f32.xlu0 %v831_v62  ;;  %v844_v62 = vunpack.c.h.bf16 %v812_v50 }
 0x188   :  { %883 = vadd.xlane.f32.xlu1 %v832_v61 }
 0x18b   :  { %885 = vadd.xlane.f32.xlu0 %v833_v63 }
 0x18c   :  { %887 = vadd.xlane.f32.xlu1 %v834_v59 }
 0x18f   :  { %857 = vadd.xlane.f32.xlu0 %v819_v39 }
 0x190   :  { %859 = vadd.xlane.f32.xlu1 %v820_v34 }
 0x193   :  { %893 = vadd.xlane.f32.xlu0 %v837_v49 }
 0x194   :  { %895 = vadd.xlane.f32.xlu1 %v838_v48 }
 0x197   :  { %865 = vadd.xlane.f32.xlu0 %v823_v43 }
 0x198   :  { %867 = vadd.xlane.f32.xlu1 %v824_v29  ;;  %v3759_v29 = vand.u32 127, %v4473_v45 }
 0x19a   :  { %v958_v33 = vadd.s32 4294967288, %v3759_v29  ;;  %v3769_v46 = vsub.s32 %v3759_v29, %v3600_v54  ;;  %vm917_vm4 = vcmp.ge.s32.totalorder %v3759_v29, %v3600_v54  ;;  %vm919_vm7 = vcmp.lt.s32.totalorder %v3759_v29, 16 }
 0x19b   :  { %869 = vadd.xlane.f32.xlu0 %v825_v36  ;;  %vm920_vm11 = vmand %vm917_vm4, %vm919_vm7 }
 0x19c   :  { %871 = vadd.xlane.f32.xlu1 %v826_v44 }
 0x19f   :  { %889 = vadd.xlane.f32.xlu0 %v835_v41  ;;  %v3765_v41 = vsub.s32 %v958_v33, %v3600_v54 }
 0x1a0   :  { %891 = vadd.xlane.f32.xlu1 %v836_v56 }
 0x1a3   :  { %897 = vadd.xlane.f32.xlu0 %v839_v26 }
 0x1a4   :  { %899 = vadd.xlane.f32.xlu1 %v840_v23 }
 0x1a7   :  { %901 = vadd.xlane.f32.xlu0 %v841_v32 }
 0x1a8   :  { %903 = vadd.xlane.f32.xlu1 %v842_v37 }
 0x1ab   :  { %873 = vadd.xlane.f32.xlu0 %v827_v47 }
 0x1ac   :  { %875 = vadd.xlane.f32.xlu1 %v828_v25 }
 0x1af   :  { %905 = vadd.xlane.f32.xlu0 %v843_v22 }
 0x1b0   :  { %907 = vadd.xlane.f32.xlu1 %v844_v62 }
 0x200   :  { %v846_v30 = vpop.xlane.xlu0 %845 }
 0x201   :  { %v850_v60 = vpop.xlane.xlu1 %849  ;;  %v957_v32 = vrot.slane %v846_v30, %v3769_v46 }
 0x202   :  { %v968_v55 = vrot.slane %v850_v60, %v3769_v46 }
 0x204   :  { %v848_v61 = vpop.xlane.xlu0 %847 }
 0x205   :  { %v852_v63 = vpop.xlane.xlu1 %851  ;;  %v962_v27 = vrot.slane %v848_v61, %v3765_v41 }
 0x206   :  { %v972_v56 = vrot.slane %v852_v63, %v3765_v41  ;;  %v911_v63 = vadd.s32 8, %v3600_v54 }
 0x207   :  { %v964_v50 = vsel %vm963_vm0, %v962_v27, %v957_v32 }
 0x208   :  { %v3746_v19 = vpop.xlane.xlu0 %877  ;;  %v973_v38 = vsel %vm963_vm0, %v972_v56, %v968_v55  ;;  %vm918_vm12 = vcmp.ge.s32.totalorder %v3759_v29, %v911_v63  ;;  %v3101_v29 = vld [vmem:[#allocation9 + $0x30] ss:$20 sps:$4 sm:$0xff]  }
 0x209   :  { %v3748_v42 = vpop.xlane.xlu1 %879  ;;  %v1101_v30 = vsel %vm1100_vm1, %v973_v38, %v964_v50  ;;  %vm921_vm13 = vmand %vm918_vm12, %vm919_vm7 }
 0x20c   :  { %v854_v59 = vpop.xlane.xlu0 %853 }
 0x20d   :  { %v856_v39 = vpop.xlane.xlu1 %855  ;;  %v977_v25 = vrot.slane %v854_v59, %v3769_v46 }
 0x20e   :  { %v981_v31 = vrot.slane %v856_v39, %v3765_v41  ;;  %v1035_v39 = vrot.slane %v3748_v42, %v3765_v41  ;;  %v1031_v42 = vrot.slane %v3746_v19, %v3769_v46 }
 0x210   :  { %v3750_v28 = vpop.xlane.xlu0 %861  ;;  %v982_v59 = vsel %vm963_vm0, %v981_v31, %v977_v25  ;;  %v1036_v38 = vsel %vm963_vm0, %v1035_v39, %v1031_v42 }
 0x211   :  { %v3752_v51 = vpop.xlane.xlu1 %863  ;;  %v995_v55 = vrot.slane %v3750_v28, %v3769_v46 }
 0x214   :  { %v882_v21 = vpop.xlane.xlu0 %881 }
 0x215   :  { %v884_v34 = vpop.xlane.xlu1 %883 }
 0x216   :  { %v1044_v22 = vrot.slane %v884_v34, %v3765_v41  ;;  %v999_v34 = vrot.slane %v3752_v51, %v3765_v41 }
 0x218   :  { %v886_v49 = vpop.xlane.xlu0 %885  ;;  %v1000_v19 = vsel %vm963_vm0, %v999_v34, %v995_v55 }
 0x219   :  { %v888_v0 = vpop.xlane.xlu1 %887  ;;  %v1049_v45 = vrot.slane %v886_v49, %v3769_v46  ;;  %v1103_v49 = vsel %vm1102_vm2, %v982_v59, %v1101_v30 }
 0x21a   :  { %v1053_v60 = vrot.slane %v888_v0, %v3765_v41 }
 0x21c   :  { %v858_v35 = vpop.xlane.xlu0 %857  ;;  %v1054_v32 = vsel %vm963_vm0, %v1053_v60, %v1049_v45 }
 0x21d   :  { %v860_v48 = vpop.xlane.xlu1 %859  ;;  %v986_v61 = vrot.slane %v858_v35, %v3769_v46 }
 0x21e   :  { %v990_v37 = vrot.slane %v860_v48, %v3765_v41  ;;  %v1040_v48 = vrot.slane %v882_v21, %v3769_v46 }
 0x220   :  { %v3754_v43 = vpop.xlane.xlu0 %893  ;;  %v991_v33 = vsel %vm963_vm0, %v990_v37, %v986_v61  ;;  %v1045_v51 = vsel %vm963_vm0, %v1044_v22, %v1040_v48 }
 0x221   :  { %v3756_v40 = vpop.xlane.xlu1 %895  ;;  %v1105_v31 = vsel %vm1104_vm3, %v991_v33, %v1103_v49 }
 0x222   :  { %v1071_v22 = vrot.slane %v3756_v40, %v3765_v41  ;;  %v1107_v34 = vsel %vm1106_vm5, %v1000_v19, %v1105_v31  ;;  %v3096_v19 = vld [vmem:[#allocation9 + $0xc] ss:$20 sps:$4 sm:$0xff]   ;;  %v3098_v31 = vld [vmem:[#allocation9 + $0x8] ss:$20 sps:$4 sm:$0xff]  }
 0x223   :  { %413 = vmatprep.subr.bf16.mxu1 %v3096_v19  ;;  %v3151_v19 = vld [vmem:[#allocation11 + $0x80] ss:$12 sps:$4 sm:$0xff]  }
 0x224   :  { %v866_v36 = vpop.xlane.xlu0 %865  ;;  %414 = vmatpush1.bf16.msra.mxu1 %v3098_v31  ;;  %v3155_v31 = vld [vmem:[#allocation11 + $0x98] ss:$12 sps:$4 sm:$0xff]  }
 0x225   :  { %v868_v1 = vpop.xlane.xlu1 %867 }
 0x226   :  { %v1008_v0 = vrot.slane %v868_v1, %v3765_v41  ;;  %v1004_v1 = vrot.slane %v866_v36, %v3769_v46 }
 0x228   :  { %v3762_v44 = vpop.xlane.xlu0 %869  ;;  %v1009_v37 = vsel %vm963_vm0, %v1008_v0, %v1004_v1 }
 0x229   :  { %v872_v53 = vpop.xlane.xlu1 %871  ;;  %v1013_v28 = vrot.slane %v3762_v44, %v3769_v46 }
 0x22a   :  { %v1017_v21 = vrot.slane %v872_v53, %v3765_v41  ;;  %v1114_v53 = vsel %vm1100_vm1, %v1045_v51, %v1036_v38 }
 0x22c   :  { %v890_v26 = vpop.xlane.xlu0 %889  ;;  %v1018_v30 = vsel %vm963_vm0, %v1017_v21, %v1013_v28  ;;  %v3099_v28 = vld [vmem:[#allocation9 + $0x34] ss:$20 sps:$4 sm:$0xff]  }
 0x22d   :  { %v892_v23 = vpop.xlane.xlu1 %891  ;;  %415 = vmatprep.subr.bf16.mxu1 %v3099_v28 }
 0x22e   :  { %v1062_v35 = vrot.slane %v892_v23, %v3765_v41  ;;  %v1058_v23 = vrot.slane %v890_v26, %v3769_v46  ;;  %v1115_v26 = vsel %vm1102_vm2, %v1054_v32, %v1114_v53  ;;  %v3102_v53 = vld [vmem:[#allocation9 + $0x5c] ss:$20 sps:$4 sm:$0xff]   ;;  %416 = vmatpush1.bf16.msra.mxu1 %v3101_v29 }
 0x22f   :  { %417 = vmatprep.subr.bf16.mxu1 %v3102_v53 }
 0x230   :  { %v898_v47 = vpop.xlane.xlu0 %897  ;;  %v1063_v50 = vsel %vm963_vm0, %v1062_v35, %v1058_v23 }
 0x231   :  { %v900_v62 = vpop.xlane.xlu1 %899  ;;  %v1076_v44 = vrot.slane %v898_v47, %v3769_v46  ;;  %v1116_v48 = vsel %vm1104_vm3, %v1063_v50, %v1115_v26  ;;  %v1109_v47 = vsel %vm1108_vm6, %v1009_v37, %v1107_v34  ;;  %v3104_v37 = vld [vmem:[#allocation9 + $0x58] ss:$20 sps:$4 sm:$0xff]   ;;  %v3110_v26 = vld [vmem:[#allocation9 + $0xa8] ss:$20 sps:$4 sm:$0xff]  }
 0x232   :  { %v1080_v25 = vrot.slane %v900_v62, %v3765_v41  ;;  %v1067_v62 = vrot.slane %v3754_v43, %v3769_v46  ;;  %v1111_v35 = vsel %vm1110_vm8, %v1018_v30, %v1109_v47  ;;  %v3105_v50 = vld [vmem:[#allocation9 + $0x84] ss:$20 sps:$4 sm:$0xff]   ;;  %418 = vmatpush1.bf16.msra.mxu1 %v3104_v37 }
 0x233   :  { %419 = vmatprep.subr.bf16.mxu1 %v3105_v50  ;;  %v3113_v30 = vld [vmem:[#allocation9 + $0xd0] ss:$20 sps:$4 sm:$0xff]  }
 0x234   :  { %v902_v56 = vpop.xlane.xlu0 %901  ;;  %v1081_v45 = vsel %vm963_vm0, %v1080_v25, %v1076_v44  ;;  %v1072_v43 = vsel %vm963_vm0, %v1071_v22, %v1067_v62  ;;  %v3107_v25 = vld [vmem:[#allocation9 + $0x80] ss:$20 sps:$4 sm:$0xff]  }
 0x235   :  { %v904_v27 = vpop.xlane.xlu1 %903  ;;  %v1085_v40 = vrot.slane %v902_v56, %v3769_v46  ;;  %v1117_v49 = vsel %vm1106_vm5, %v1072_v43, %v1116_v48  ;;  %v3111_v22 = vld [vmem:[#allocation9 + $0xd4] ss:$20 sps:$4 sm:$0xff]   ;;  %v3428_v43 = vmov 0.0  }
 0x236   :  { %v1089_v60 = vrot.slane %v904_v27, %v3765_v41  ;;  %v1118_v63 = vsel %vm1108_vm6, %v1081_v45, %v1117_v49  ;;  %420 = vmatpush1.bf16.msra.mxu1 %v3107_v25  ;;  %v3114_v45 = vld [vmem:[#allocation9 + $0xfc] ss:$20 sps:$4 sm:$0xff]   ;;  %2806 = vmatprep.subr.bf16.mxu0 %v3428_v43  ;;  %v3125_v49 = vld [vmem:[#allocation9 + $0xd8] ss:$20 sps:$4 sm:$0xff]  }
 0x237   :  { %2822 = vmatprep.mubr.msk.bf16.mxu0 %vm3429_vm14, %v3428_v43  ;;  %v3128_v25 = vld [vmem:[#allocation11] ss:$12 sps:$4 sm:$0xff]  }
 0x238   :  { %v874_v36 = vpop.xlane.xlu0 %873  ;;  %v1090_v56 = vsel %vm963_vm0, %v1089_v60, %v1085_v40 }
 0x239   :  { %v876_v61 = vpop.xlane.xlu1 %875  ;;  %v1022_v39 = vrot.slane %v874_v36, %v3769_v46  ;;  %v1119_v23 = vsel %vm1110_vm8, %v1090_v56, %v1118_v63  ;;  %v3108_v36 = vld [vmem:[#allocation9 + $0xac] ss:$20 sps:$4 sm:$0xff]   ;;  %v3120_v56 = vld [vmem:[#allocation9 + $0x10] ss:$20 sps:$4 sm:$0xff]   ;;  %v3127_v63 = vld [vmem:[#allocation9 + $0x128] ss:$20 sps:$4 sm:$0xff]  }
 0x23a   :  { %v1026_v59 = vrot.slane %v876_v61, %v3765_v41  ;;  %421 = vmatprep.subr.bf16.mxu1 %v3108_v36  ;;  %2807 = vmatpush3.bf16.msra.mxu0 %v3120_v56 }
 0x23b   :  { %422 = vmatpush1.bf16.msra.mxu1 %v3110_v26  ;;  %2808 = vmatprep.subr.bf16.mxu0 %v3428_v43  ;;  %v3134_v26 = vld [vmem:[#allocation11 + $0x1c] ss:$12 sps:$4 sm:$0xff]  }
 0x23c   :  { %v906_v33 = vpop.xlane.xlu0 %905  ;;  %v1027_v0 = vsel %vm963_vm0, %v1026_v59, %v1022_v39  ;;  %423 = vmatprep.subr.bf16.mxu1 %v3111_v22  ;;  %v3132_v22 = vld [vmem:[#allocation11 + $0x18] ss:$12 sps:$4 sm:$0xff]  }
 0x23d   :  { %v908_v42 = vpop.xlane.xlu1 %907  ;;  %v1113_v55 = vsel %vm1112_vm9, %v1027_v0, %v1111_v35  ;;  %v1094_v51 = vrot.slane %v906_v33, %v3769_v46  ;;  %v3116_v33 = vld [vmem:[#allocation9 + $0xf8] ss:$20 sps:$4 sm:$0xff]   ;;  %v3119_v35 = vld [vmem:[#allocation9 + $0x120] ss:$20 sps:$4 sm:$0xff]  }
 0x23e   :  { %v1098_v21 = vrot.slane %v908_v42, %v3765_v41  ;;  %v1123_v27 = vsel %vm920_vm11, %v1113_v55, -1e+30  ;;  %v3117_v0 = vld [vmem:[#allocation9 + $0x124] ss:$20 sps:$4 sm:$0xff]  }
 0x23f   :  { %v1126_v32 = vsel %vm1125_vm10, %v1123_v27, -inf  ;;  %424 = vmatpush1.bf16.msra.mxu1 %v3113_v30  ;;  %v3121_v42 = vld [vmem:[#allocation9 + $0x38] ss:$20 sps:$4 sm:$0xff]   ;;  %v3130_v55 = vld [vmem:[#allocation11 + $0x4] ss:$12 sps:$4 sm:$0xff]   ;;  %v4474_v30 = vmov 0  }
 0x240   :  { %1127 = vmax.xlane.f32.xlu0 %v1126_v32  ;;  %v1099_v1 = vsel %vm963_vm0, %v1098_v21, %v1094_v51  ;;  %425 = vmatprep.subr.bf16.mxu1 %v3114_v45  ;;  %v3122_v51 = vld [vmem:[#allocation9 + $0x60] ss:$20 sps:$4 sm:$0xff]   ;;  %v3123_v21 = vld [vmem:[#allocation9 + $0x88] ss:$20 sps:$4 sm:$0xff]  }
 0x241   :  { %v1120_v38 = vsel %vm1112_vm9, %v1099_v1, %v1119_v23  ;;  %2809 = vmatpush3.bf16.msra.mxu0 %v3121_v42  ;;  %v3126_v32 = vld [vmem:[#allocation9 + $0x100] ss:$20 sps:$4 sm:$0xff]  }
 0x242   :  { %v1124_v46 = vsel %vm921_vm13, %v1120_v38, -1e+30  ;;  %2810 = vmatprep.subr.bf16.mxu0 %v3428_v43  ;;  %v3131_v1 = vld [vmem:[#allocation11 + $0x8] ss:$12 sps:$4 sm:$0xff]   ;;  %v3135_v23 = vld [vmem:[#allocation11 + $0x20] ss:$12 sps:$4 sm:$0xff]  }
 0x243   :  { %v1129_v41 = vsel %vm1125_vm10, %v1124_v46, -inf  ;;  %426 = vmatpush1.bf16.msra.mxu1 %v3116_v33  ;;  %v3139_v38 = vld [vmem:[#allocation11 + $0x38] ss:$12 sps:$4 sm:$0xff]   ;;  %v3156_v45 = vld [vmem:[#allocation11 + $0xa8] ss:$12 sps:$4 sm:$0xff]  }
 0x244   :  { %1130 = vmax.xlane.f32.xlu1 %v1129_v41  ;;  %427 = vmatprep.subr.bf16.mxu1 %v3117_v0  ;;  %v3147_v41 = vld [vmem:[#allocation11 + $0x68] ss:$12 sps:$4 sm:$0xff]   ;;  %v3158_v33 = vld [vmem:[#allocation11 + $0xac] ss:$12 sps:$4 sm:$0xff]   ;;  %v3159_v0 = vld [vmem:[#allocation11 + $0xb0] ss:$12 sps:$4 sm:$0xff]  }
 0x245   :  { %2811 = vmatpush3.bf16.msra.mxu0 %v3122_v51  ;;  %v4436_v51 = vsub.s32 2, %v3600_v54 }
 0x246   :  { %2812 = vmatprep.subr.bf16.mxu0 %v3428_v43 }
 0x247   :  { %428 = vmatpush1.bf16.msra.mxu1 %v3119_v35 }
 0x248   :  { %2826 = vmatprep.subr.bf16.mxu1 %v3428_v43 }
 0x249   :  { %2813 = vmatpush3.bf16.msra.mxu0 %v3123_v21  ;;  %v155_v21 = vsub.s32 4, %v3600_v54 }
 0x24a   :  { %446 = vmatmul.mubr.bf16.vlgmr.msra.gmra.mrb[0].mxu1 %v3596_v52  ;;  %2814 = vmatprep.subr.bf16.mxu0 %v3428_v43 }
 0x24b   :  { %2827 = vmatpush3.bf16.msra.mxu1 %v3596_v52  ;;  %2828 = vmatprep.mubr.msk.bf16.mxu1 %vm3429_vm14, %v3428_v43 }
 0x24c   :  { %1364 = vmatprep.subr.bf16.mxu1 %v3130_v55 }
 0x2cd   :  { %v1128_v60 = vpop.xlane.xlu0 %1127 }
 0x2ce   :  { %v1132_v61 = vsub.f32 %v1123_v27, %v1128_v60  ;;  %v3124_v27 = vld [vmem:[#allocation9 + $0xb0] ss:$20 sps:$4 sm:$0xff]   ;;  %v3138_v60 = vld [vmem:[#allocation11 + $0x34] ss:$12 sps:$4 sm:$0xff]  }
 0x2cf   :  { %2815 = vmatpush3.bf16.msra.mxu0 %v3124_v27  ;;  %v151_v27 = vsub.s32 3, %v3600_v54 }
 0x2d0   :  { %v1134_v44 = vmul.f32 1.442695, %v1132_v61  ;;  %2816 = vmatprep.subr.bf16.mxu0 %v3428_v43  ;;  %v3136_v61 = vld [vmem:[#allocation11 + $0x30] ss:$12 sps:$4 sm:$0xff]  }
 0x2d1   :  { %v1131_v39 = vpop.xlane.xlu1 %1130 }
 0x2d2   :  { %3192 = vpow2.f32 %v1134_v44  ;;  %v1133_v59 = vsub.f32 %v1124_v46, %v1131_v39  ;;  %v3143_v46 = vld [vmem:[#allocation11 + $0x50] ss:$12 sps:$4 sm:$0xff]   ;;  %v3142_v44 = vld [vmem:[#allocation11 + $0x4c] ss:$12 sps:$4 sm:$0xff]   ;;  %v3140_v39 = vld [vmem:[#allocation11 + $0x48] ss:$12 sps:$4 sm:$0xff]  }
 0x2d3   :  { %2817 = vmatpush3.bf16.msra.mxu0 %v3125_v49  ;;  %v148_v49 = vrot.slane %v3608_v58, %v4436_v51 }
 0x2d4   :  { %v1136_v34 = vmul.f32 1.442695, %v1133_v59  ;;  %2818 = vmatprep.subr.bf16.mxu0 %v3428_v43  ;;  %v3146_v59 = vld [vmem:[#allocation11 + $0x64] ss:$12 sps:$4 sm:$0xff]  }
 0x2d6   :  { %3194 = vpow2.f32 %v1136_v34  ;;  %v3144_v34 = vld [vmem:[#allocation11 + $0x60] ss:$12 sps:$4 sm:$0xff]  }
 0x2d7   :  { %2819 = vmatpush3.bf16.msra.mxu0 %v3126_v32  ;;  %v156_v32 = vrot.slane %v3608_v58, %v155_v21 }
 0x2d8   :  { %2820 = vmatprep.subr.bf16.mxu0 %v3428_v43 }
 0x2db   :  { %2821 = vmatpush3.bf16.msra.mxu0 %v3127_v63  ;;  %v152_v63 = vrot.slane %v3608_v58, %v151_v27  ;;  %v3880_v58 = vmov 0.0  }
 0x2dc   :  { %v3854_v62 = vpop.eup %3192  ;;  %2832 = vmatprep.subr.bf16.mxu0 %v3428_v43 }
 0x2dd   :  { %v1138_v48 = vsel %vm1125_vm10, %v3854_v62, 0.0 }
 0x2de   :  { %1139 = vadd.xlane.f32.xlu0 %v1138_v48  ;;  %2823 = vmatmul.mubr.bf16.vlgmr.msra.gmra.mrb[4].mxu0 %v3596_v52  ;;  %v3148_v48 = vld [vmem:[#allocation11 + $0x78] ss:$12 sps:$4 sm:$0xff]  }
 0x2df   :  { %2833 = vmatpush3.bf16.msra.mxu0 %v3131_v1  ;;  %2848 = vmatprep.mubr.msk.bf16.mxu0 %vm3429_vm14, %v3428_v43 }
 0x2e0   :  { %v3858_v40 = vpop.eup %3194  ;;  %2834 = vmatprep.subr.bf16.mxu0 %v3428_v43 }
 0x2e1   :  { %v1141_v47 = vsel %vm1125_vm10, %v3858_v40, 0.0 }
 0x2e2   :  { %1142 = vadd.xlane.f32.xlu1 %v1141_v47  ;;  %v3152_v47 = vld [vmem:[#allocation11 + $0x90] ss:$12 sps:$4 sm:$0xff]  }
 0x2e3   :  { %2835 = vmatpush3.bf16.msra.mxu0 %v3135_v23 }
 0x2e4   :  { %2836 = vmatprep.subr.bf16.mxu0 %v3428_v43 }
 0x2e7   :  { %2837 = vmatpush3.bf16.msra.mxu0 %v3139_v38 }
 0x2e8   :  { %2838 = vmatprep.subr.bf16.mxu0 %v3428_v43 }
 0x2eb   :  { %2839 = vmatpush3.bf16.msra.mxu0 %v3143_v46 }
 0x2ec   :  { %2840 = vmatprep.subr.bf16.mxu0 %v3428_v43 }
 0x2ef   :  { %2841 = vmatpush3.bf16.msra.mxu0 %v3147_v41 }
 0x2f0   :  { %2842 = vmatprep.subr.bf16.mxu0 %v3428_v43 }
 0x2f3   :  { %2843 = vmatpush3.bf16.msra.mxu0 %v3151_v19 }
 0x2f4   :  { %2844 = vmatprep.subr.bf16.mxu0 %v3428_v43 }
 0x2f7   :  { %2845 = vmatpush3.bf16.msra.mxu0 %v3155_v31 }
 0x2f8   :  { %2846 = vmatprep.subr.bf16.mxu0 %v3428_v43 }
 0x2fb   :  { %2847 = vmatpush3.bf16.msra.mxu0 %v3159_v0 }
 0x36b   :  { %v1140_v52 = vpop.xlane.xlu0 %1139 }
 0x36c   :  { %3196 = vrcp.f32 %v1140_v52 }
 0x36f   :  { %v1143_v28 = vpop.xlane.xlu1 %1142 }
 0x370   :  { %3198 = vrcp.f32 %v1143_v28 }
 0x376   :  { %v3197_v29 = vpop.eup %3196 }
 0x377   :  { %v1146_v37 = vmul.f32 %v3197_v29, %v3854_v62  ;;  %v3150_v62 = vld [vmem:[#allocation11 + $0x7c] ss:$12 sps:$4 sm:$0xff]  }
 0x37a   :  { %v3199_v53 = vpop.eup %3198 }
 0x37b   :  { %v1147_v50 = vmul.f32 %v3199_v53, %v3858_v40  ;;  %v3154_v40 = vld [vmem:[#allocation11 + $0x94] ss:$12 sps:$4 sm:$0xff]  }
 0x37d   :  { %v1148_v36 = vpack.c.bf16 %v1147_v50, %v1146_v37 }
 0x37f   :  { %2829 = vmatmul.mubr.msk.bf16.vlgmr.msra.gmra.mrb[4].mxu1 %vm1125_vm10, %v1148_v36 }
 0x380   :  { %1365 = vmatpush1.bf16.msra.mxu1 %v3128_v25  ;;  %1396 = vmatprep.mubr.bf16.mxu1 %v4474_v30 }
 0x381   :  { %1366 = vmatprep.subr.bf16.mxu1 %v3134_v26 }
 0x384   :  { %1367 = vmatpush1.bf16.msra.mxu1 %v3132_v22 }
 0x385   :  { %1368 = vmatprep.subr.bf16.mxu1 %v3138_v60 }
 0x388   :  { %1369 = vmatpush1.bf16.msra.mxu1 %v3136_v61 }
 0x389   :  { %1370 = vmatprep.subr.bf16.mxu1 %v3142_v44 }
 0x38c   :  { %1371 = vmatpush1.bf16.msra.mxu1 %v3140_v39 }
 0x38d   :  { %1372 = vmatprep.subr.bf16.mxu1 %v3146_v59 }
 0x390   :  { %1373 = vmatpush1.bf16.msra.mxu1 %v3144_v34 }
 0x391   :  { %1374 = vmatprep.subr.bf16.mxu1 %v3150_v62 }
 0x394   :  { %1375 = vmatpush1.bf16.msra.mxu1 %v3148_v48 }
 0x395   :  { %1376 = vmatprep.subr.bf16.mxu1 %v3154_v40 }
 0x398   :  { %1377 = vmatpush1.bf16.msra.mxu1 %v3152_v47 }
 0x399   :  { %1378 = vmatprep.subr.bf16.mxu1 %v3158_v33 }
 0x39c   :  { %1379 = vmatpush1.bf16.msra.mxu1 %v3156_v45 }
 0x452   :  { %v1187_v35 = vpop.f32.mrb[4].mxu1 }
 0x453   :  { %v2830_v43 = vpop.f32.mrb[5].mxu1 }
 0x454   :  { %v1190_v56 = vpop.f32.mrb[6].mxu1 }
 0x455   :  { %v1203_v42 = vpack.c.bf16 %v1190_v56, %v1187_v35  ;;  %v2831_v55 = vpop.f32.mrb[7].mxu1 }
 0x457   :  { %1397 = vmatmul.mubr.bf16.vlgmr.msra.gmra.mrb[0].mxu1 %v1203_v42  ;;  %2849 = vmatmul.mubr.bf16.vlgmr.msra.gmra.mrb[4].mxu0 %v1203_v42 }
 0x52a   :  { %v1398_v1 = vpop.f32.mrb[0].mxu1  ;;  %v1441_v23 = vpop.f32.mrb[4].mxu0 }
 0x52b   :  { %v3014_v38 = vadd.f32 %v1398_v1, %v148_v49  ;;  %v3026_v46 = vadd.f32 %v1441_v23, %v156_v32  ;;  %v1400_v41 = vpop.f32.mrb[1].mxu1  ;;  %v2850_v19 = vpop.f32.mrb[5].mxu0 }
 0x52c   :  { %v3017_v31 = vadd.f32 %v1400_v41, %v152_v63  ;;  %v1402_v52 = vpop.f32.mrb[2].mxu1  ;;  %v1444_v28 = vpop.f32.mrb[6].mxu0 }
 0x52d   :  { %1454 = vst [vmem:[#allocation4] sm:$0xff] %v3014_v38  ;;  %1456 = vst [vmem:[#allocation4 + $0x10] sm:$0xff] %v3026_v46  ;;  %v3020_v29 = vadd.f32 %v1402_v52, %v148_v49  ;;  %v3029_v53 = vadd.f32 %v1444_v28, %v156_v32  ;;  %v1404_v37 = vpop.f32.mrb[3].mxu1  ;;  %v2851_v50 = vpop.f32.mrb[7].mxu0 }
 0x52e   :  { %1455 = vst [vmem:[#allocation4 + $0x8] sm:$0xff] %v3017_v31  ;;  %v3023_v25 = vadd.f32 %v1404_v37, %v152_v63 }
 0x52f   :  { %1457 = vst [vmem:[#allocation4 + $0x18] sm:$0xff] %v3020_v29  ;;  %1459 = vst [vmem:[#allocation4 + $0x28] sm:$0xff] %v3029_v53 }
 0x530   :  { %1458 = vst [vmem:[#allocation4 + $0x20] sm:$0xff] %v3023_v25 }
 0x531 LB: > { %v4475_v14 = vld [vmem:[#allocation32_spill] sm:$0xff]  ;;  %v4476_v12 = vld [vmem:[#allocation30_spill] sm:$0xff]  ;;  %v4482_v5 = vld [vmem:[#allocation23_spill] sm:$0xff]  ;;  %v4434_v44 = vmov 0.0   ;;  %v4432_v59 = vmov 0   ;;  %vm3432_vm15 = vmmov 0   ;;  %v3951_v47 = vcombine.high %v3564_v18, %v3568_v20  ;;  %v3410_v58 = vphi %v3880_v58, %v2558_v58   ;;  %s3414_s3 = sphi %s3882_s3, %s1465_s3  }
 0x532   : > { %v4477_v10 = vld [vmem:[#allocation28_spill] sm:$0xff]  ;;  %v4478_v8 = vld [vmem:[#allocation26_spill] sm:$0xff]  ;;  %v4483_v3 = vld [vmem:[#allocation21_spill] sm:$0xff]  ;;  %2852 = vmatprep.subr.bf16.mxu1 %v4434_v44  ;;  %1658 = vmatprep.mubr.bf16.mxu0 %v4432_v59  ;;  %v3933_v62 = vcombine.high %v4475_v14, %v3560_v16  ;;  %v3946_v40 = vcombine.low %v4475_v14, %v3560_v16  ;;  %v3962_v33 = vcombine.low %v3564_v18, %v3568_v20  ;;  %s2671_s10 = sshll.u32 %s3414_s3, 3  ;;  %vm2559_vm0 = vcmask 1040384   ;;  %s1465_s3 = sadd.s32 1, %s3414_s3  }
 0x533   : > { %v4479_v6 = vld [vmem:[#allocation24_spill] sm:$0xff]  ;;  %v4480_v4 = vld [vmem:[#allocation22_spill] sm:$0xff]  ;;  %v3910_v60 = vcombine.low %v4483_v3, %v4482_v5  ;;  %v3915_v61 = vcombine.high %v4477_v10, %v4476_v12  ;;  %v4484_v9 = vld [vmem:[#allocation27_spill] sm:$0xff]  ;;  %v3928_v34 = vcombine.low %v4477_v10, %v4476_v12  ;;  %2868 = vmatprep.mubr.msk.bf16.mxu1 %vm3432_vm15, %v4434_v44  ;;  %v1476_v23 = vpack.c.bf16 %v3410_v58, %v3410_v58  ;;  %s1468_s11 = sshra.s32 %s2671_s10, 3  ;;  %s2573_s14 = scalar_lea.vmem [#allocation14], %s2671_s10 }
 0x534   : > { %v4481_v2 = vld [vmem:[#allocation20_spill] sm:$0xff]  ;;  %v3900_v22 = vcombine.high %v4479_v6, %v4478_v8  ;;  %v3906_v30 = vcombine.low %v4479_v6, %v4478_v8  ;;  %v4485_v7 = vld [vmem:[#allocation25_spill] sm:$0xff]  ;;  %v4486_v13 = vld [vmem:[#allocation31_spill] sm:$0xff]  ;;  %s2713_s12 = smul.u32 24, %s1468_s11  ;;  %vm2561_vm1 = vcmask 1041408   ;;  %vm2563_vm2 = vcmask 1042432  }
 0x535   : > { %v3892_v36 = vcombine.high %v4481_v2, %v4480_v4  ;;  %v3896_v26 = vcombine.low %v4481_v2, %v4480_v4  ;;  %2853 = vmatpush3.bf16.msra.mxu1 %v3910_v60  ;;  %v3921_v39 = vcombine.low %v4485_v7, %v4484_v9  ;;  %v4487_v11 = vld [vmem:[#allocation29_spill] sm:$0xff]  ;;  %v4489_v0 = vld [vmem:[#allocation36_spill] sm:$0xff]  ;;  %v4490_v43 = vld [vmem:[#allocation35_spill] sm:$0xff]  ;;  %v1478_v29 = vshrl.u32 %v1476_v23, 16  ;;  %p1462_p4 = scmp.ge.s32.totalorder %s1465_s3, 2  }
 0x536   : > { %2854 = vmatprep.subr.bf16.mxu1 %v4434_v44  ;;  %v3940_v48 = vcombine.low %v4487_v11, %v4486_v13  ;;  %v4488_v15 = vld [vmem:[#allocation33_spill] sm:$0xff]  ;;  %v3967_v35 = vcombine.high %v4489_v0, %v3576_v24  ;;  %v4491_v56 = vld [vmem:[#allocation34_spill] sm:$0xff]  ;;  %v3978_v55 = vcombine.low %v4489_v0, %v3576_v24  ;;  %v4493_v27 = vld [vmem:[#allocation39_spill] sm:$0xff]  ;;  %s4072_s13 = scalar_lea.vmem [#allocation4], %s2713_s12  ;;  %vm2565_vm3 = vcmask 1043456   ;;  %s3433_s0 = smov (%p1462_p4), [#allocation14]  }
 0x537   : > { %1626 = vmatprep.subr.bf16.mxu0 %v3892_v36  ;;  %v3956_v45 = vcombine.low %v4488_v15, %v3562_v17  ;;  %v3972_v42 = vcombine.low %v4491_v56, %v4490_v43  ;;  %v4492_v21 = vld [vmem:[#allocation41_spill] sm:$0xff]  ;;  %v4494_v32 = vld [vmem:[#allocation38_spill] sm:$0xff]  ;;  %v4497_v41 = vld [vmem:[#allocation43_spill] sm:$0xff]  ;;  %v1480_v43 = vrot.slane %v1478_v29, 3  ;;  %vm2567_vm4 = vcmask 1044480   ;;  %s2580_s15 = sshll.u32 (%p1462_p4), %s3433_s0, 4  ;;  %s2581_s15 = int_to_ptr.vmem [resolvable:$true] %s2580_s15 }
 0x538   : > { %1627 = vmatpush1.bf16.msra.mxu0 %v3896_v26  ;;  %v3983_v49 = vcombine.high %v4493_v27, %v4492_v21  ;;  %v4495_v63 = vld [vmem:[#allocation37_spill] sm:$0xff]  ;;  %v3996_v38 = vcombine.low %v4493_v27, %v4492_v21  ;;  %v4498_v31 = vld [vmem:[#allocation42_spill] sm:$0xff]  ;;  %v4499_v52 = vld [vmem:[#allocation40_spill] sm:$0xff]  ;;  %vm2569_vm5 = vcmask 1045504   ;;  %vm2571_vm6 = vcmask 1046528   ;;  %s3370_s16 = scalar_lea.vmem (%p1462_p4), %s2581_s15, 256  ;;  %p3375_p6 = scmp.lt.s32.totalorder (%p1462_p4), %s2581_s15, %s2581_s15 }
 0x539   : > { %1628 = vmatprep.subr.bf16.mxu0 %v3900_v22  ;;  %2855 = vmatpush3.bf16.msra.mxu1 %v3921_v39  ;;  %v3988_v1 = vcombine.low %v4495_v63, %v4494_v32  ;;  %v4496_v46 = vld [vmem:[#allocation45_spill] sm:$0xff]  ;;  %v4006_v28 = vcombine.low %v4499_v52, %v4498_v31  ;;  %v4500_v37 = vld [vmem:[#allocation46_spill] sm:$0xff]  ;;  %v4501_v50 = vld [vmem:[#allocation44_spill] sm:$0xff]  ;;  %v4503_v63 = vsub.s32 1, %v3600_v54  ;;  %p3371_p5 = scmp.ne.s32.totalorder (%p1462_p4), %s2581_s15, %s3370_s16  ;;  %p3376_p7 = scmp.lt.s32.totalorder (%p1462_p4), %s3370_s16, %s3370_s16 }
 0x53a   : > { %2856 = vmatprep.subr.bf16.mxu1 %v4434_v44  ;;  %v4001_v19 = vcombine.high %v4497_v41, %v4496_v46  ;;  %v4012_v53 = vcombine.low %v4497_v41, %v4496_v46  ;;  %v4018_v25 = vcombine.low %v4501_v50, %v4500_v37  ;;  %v4502_v56 = vld [vmem:[#allocation19_spill] sm:$0xff]  ;;  %v4075_v31 = vld [vmem:[%s4072_s13] sm:$0xff]  ;;  %v4079_v37 = vld [vmem:[%s4072_s13 + $0x8] sm:$0xff] }
 0x53b   : > { %v4065_v32 = vrot.slane %v4502_v56, %v3603_v57  ;;  %v4070_v23 = vrot.slane %v4502_v56, %v4503_v63  ;;  %p3377_p8 = por (%p1462_p4), %p3376_p7, %p3375_p6 }
 0x53c   : > { %1629 = vmatpush1.bf16.msra.mxu0 %v3906_v30 }
 0x53d   : > { %1630 = vmatprep.subr.bf16.mxu0 %v3915_v61  ;;  %2857 = vmatpush3.bf16.msra.mxu1 %v3940_v48  ;;  %p3378_p9 = pnand (%p1462_p4), %p3377_p8, %p3371_p5 }
 0x53e   : > { %2858 = vmatprep.subr.bf16.mxu1 %v4434_v44 }
 0x540   : > { %1631 = vmatpush1.bf16.msra.mxu0 %v3928_v34 }
 0x541   : > { %1632 = vmatprep.subr.bf16.mxu0 %v3933_v62  ;;  %2859 = vmatpush3.bf16.msra.mxu1 %v3956_v45 }
 0x542   : > { %2860 = vmatprep.subr.bf16.mxu1 %v4434_v44 }
 0x544   : > { %1633 = vmatpush1.bf16.msra.mxu0 %v3946_v40 }
 0x545   : > { %1634 = vmatprep.subr.bf16.mxu0 %v3951_v47  ;;  %2861 = vmatpush3.bf16.msra.mxu1 %v3972_v42 }
 0x546   : > { %2862 = vmatprep.subr.bf16.mxu1 %v4434_v44 }
 0x548   : > { %1635 = vmatpush1.bf16.msra.mxu0 %v3962_v33 }
 0x549   : > { %1636 = vmatprep.subr.bf16.mxu0 %v3967_v35  ;;  %2863 = vmatpush3.bf16.msra.mxu1 %v3988_v1 }
 0x54a   : > { %2864 = vmatprep.subr.bf16.mxu1 %v4434_v44 }
 0x54c   : > { %1637 = vmatpush1.bf16.msra.mxu0 %v3978_v55 }
 0x54d   : > { %1638 = vmatprep.subr.bf16.mxu0 %v3983_v49  ;;  %2865 = vmatpush3.bf16.msra.mxu1 %v4006_v28 }
 0x54e   : > { %2866 = vmatprep.subr.bf16.mxu1 %v4434_v44 }
 0x550   : > { %1639 = vmatpush1.bf16.msra.mxu0 %v3996_v38 }
 0x551   : > { %1640 = vmatprep.subr.bf16.mxu0 %v4001_v19  ;;  %2867 = vmatpush3.bf16.msra.mxu1 %v4018_v25 }
 0x552   : > { %2872 = vmatprep.subr.bf16.mxu1 %v4434_v44 }
 0x554   : > { %1641 = vmatpush1.bf16.msra.mxu0 %v4012_v53  ;;  %2869 = vmatmul.mubr.bf16.vlgmr.msra.gmra.mrb[0].mxu1 %v1480_v43 }
 0x555   : > { %1732 = vmatprep.subr.bf16.mxu0 %v3892_v36  ;;  %2873 = vmatpush3.bf16.msra.mxu1 %v3910_v60 }
 0x556   : > { %2888 = vmatprep.mubr.msk.bf16.mxu1 %vm3432_vm15, %v4434_v44  ;;  %2874 = vmatprep.subr.bf16.mxu1 %v4434_v44 }
 0x557   : > { %1659 = vmatmul.mubr.bf16.vlgmr.msra.gmra.mrb[0].mxu0 %v1480_v43 }
 0x558   : > { %1733 = vmatpush1.bf16.msra.mxu0 %v3896_v26  ;;  %1764 = vmatprep.mubr.bf16.mxu0 %v4432_v59 }
 0x559   : > { %1734 = vmatprep.subr.bf16.mxu0 %v3900_v22  ;;  %2875 = vmatpush3.bf16.msra.mxu1 %v3921_v39 }
 0x55a   : > { %2876 = vmatprep.subr.bf16.mxu1 %v4434_v44 }
 0x55c   : > { %1735 = vmatpush1.bf16.msra.mxu0 %v3906_v30 }
 0x55d   : > { %1736 = vmatprep.subr.bf16.mxu0 %v3915_v61  ;;  %2877 = vmatpush3.bf16.msra.mxu1 %v3940_v48 }
 0x55e   : > { %2878 = vmatprep.subr.bf16.mxu1 %v4434_v44 }
 0x560   : > { %1737 = vmatpush1.bf16.msra.mxu0 %v3928_v34 }
 0x561   : > { %1738 = vmatprep.subr.bf16.mxu0 %v3933_v62  ;;  %2879 = vmatpush3.bf16.msra.mxu1 %v3956_v45 }
 0x562   : > { %2880 = vmatprep.subr.bf16.mxu1 %v4434_v44 }
 0x564   : > { %1739 = vmatpush1.bf16.msra.mxu0 %v3946_v40 }
 0x565   : > { %1740 = vmatprep.subr.bf16.mxu0 %v3951_v47  ;;  %2881 = vmatpush3.bf16.msra.mxu1 %v3972_v42 }
 0x566   : > { %2882 = vmatprep.subr.bf16.mxu1 %v4434_v44 }
 0x568   : > { %1741 = vmatpush1.bf16.msra.mxu0 %v3962_v33 }
 0x569   : > { %1742 = vmatprep.subr.bf16.mxu0 %v3967_v35  ;;  %2883 = vmatpush3.bf16.msra.mxu1 %v3988_v1 }
 0x56a   : > { %2884 = vmatprep.subr.bf16.mxu1 %v4434_v44 }
 0x56c   : > { %1743 = vmatpush1.bf16.msra.mxu0 %v3978_v55 }
 0x56d   : > { %1744 = vmatprep.subr.bf16.mxu0 %v3983_v49  ;;  %2885 = vmatpush3.bf16.msra.mxu1 %v4006_v28 }
 0x56e   : > { %2886 = vmatprep.subr.bf16.mxu1 %v4434_v44 }
 0x570   : > { %1745 = vmatpush1.bf16.msra.mxu0 %v3996_v38 }
 0x571   : > { %1746 = vmatprep.subr.bf16.mxu0 %v4001_v19  ;;  %2887 = vmatpush3.bf16.msra.mxu1 %v4018_v25 }
 0x572   : > { %2892 = vmatprep.subr.bf16.mxu1 %v4434_v44 }
 0x574   : > { %1747 = vmatpush1.bf16.msra.mxu0 %v4012_v53 }
 0x575   : > { %1851 = vmatprep.subr.bf16.mxu0 %v3892_v36 }
 0x627   : > { %v1701_v44 = vpop.f32.mrb[0].mxu1 }
 0x628   : > { %v2870_v0 = vpop.f32.mrb[1].mxu1 }
 0x629   : > { %v1704_v3 = vpop.f32.mrb[2].mxu1 }
 0x62a   : > { %v1660_v52 = vpop.f32.mrb[0].mxu0  ;;  %v2871_v5 = vpop.f32.mrb[3].mxu1  ;;  %v1727_v3 = vrot.slane %v3410_v58, 7  ;;  %v4505_v58 = vmov 0.0  }
 0x62b   : > { %v1661_v29 = vadd.f32 %v1660_v52, %v4065_v32  ;;  %v1662_v50 = vpop.f32.mrb[1].mxu0  ;;  %v4092_v5 = vld [vmem:[%s4072_s13 + $0x10] sm:$0xff] }
 0x62c   : > { %v1663_v43 = vadd.f32 %v1662_v50, %v4070_v23  ;;  %v1664_v59 = vpop.f32.mrb[2].mxu0 }
 0x62d   : > { %v1707_v51 = vadd.f32 %v1661_v29, %v4075_v31  ;;  %v1665_v63 = vpop.f32.mrb[3].mxu0  ;;  %v4504_v59 = vsub.s32 2, %v3600_v54 }
 0x62e   : > { %v1714_v2 = vadd.f32 %v1663_v43, %v4079_v37 }
 0x62f   : > { %v2697_v4 = vmul.f32 -1.442695, %v1707_v51  ;;  %v4087_v29 = vrot.slane %v4502_v56, %v4504_v59 }
 0x630   : > { %v2698_v6 = vmul.f32 -1.442695, %v1714_v2 }
 0x631   : > { %3200 = vpow2.f32 %v2697_v4  ;;  %v1702_v0 = vadd.f32 %v1701_v44, %v4087_v29  ;;  %v4506_v44 = vmov 0  }
 0x632   : > { %3202 = vpow2.f32 %v2698_v6 }
 0x63b   : > { %v3201_v52 = vpop.eup %3200 }
 0x63c   : > { %v3203_v7 = vpop.eup %3202  ;;  %v1711_v8 = vadd.f32 1.0, %v3201_v52 }
 0x63d   : > { %v1718_v9 = vadd.f32 1.0, %v3203_v7 }
 0x63e   : > { %3204 = vrcp.f32 %v1711_v8 }
 0x63f   : > { %3206 = vrcp.f32 %v1718_v9 }
 0x648   : > { %v3205_v51 = vpop.eup %3204 }
 0x649   : > { %v3207_v2 = vpop.eup %3206  ;;  %v1721_v4 = vmul.f32 %v3205_v51, %v1702_v0 }
 0x64a   : > { %v1729_v6 = vmul.f32 %v3207_v2, %v1727_v3  ;;  %v1724_v7 = vsub.f32 1.0, %v3207_v2 }
 0x64b   : > { %v1722_v50 = vadd.f32 %v1721_v4, %v4092_v5 }
 0x64d   : > { %3208 = vtanh.f32 %v1722_v50 }
 0x657   : > { %v3209_v8 = vpop.eup %3208 }
 0x658   : > { %v1725_v9 = vmul.f32 %v3209_v8, %v1724_v7 }
 0x65a   : > { %v4095_v43 = vadd.f32 %v1729_v6, %v1725_v9 }
 0x65c   : > { %v1731_v63 = vpack.c.bf16 %v4095_v43, %v4095_v43 }
 0x65e   : > { %1765 = vmatmul.mubr.bf16.vlgmr.msra.gmra.mrb[4].mxu0 %v1731_v63  ;;  %2889 = vmatmul.mubr.bf16.vlgmr.msra.gmra.mrb[4].mxu1 %v1731_v63 }
 0x65f   : > { %1852 = vmatpush1.bf16.msra.mxu0 %v3896_v26  ;;  %2893 = vmatpush3.bf16.msra.mxu1 %v3910_v60 }
 0x660   : > { %1853 = vmatprep.subr.bf16.mxu0 %v3900_v22  ;;  %2894 = vmatprep.subr.bf16.mxu1 %v4505_v58 }
 0x661   : > { %1883 = vmatprep.mubr.bf16.mxu0 %v4506_v44  ;;  %2908 = vmatprep.mubr.msk.bf16.mxu1 %vm3432_vm15, %v4505_v58 }
 0x663   : > { %1854 = vmatpush1.bf16.msra.mxu0 %v3906_v30  ;;  %2895 = vmatpush3.bf16.msra.mxu1 %v3921_v39 }
 0x664   : > { %1855 = vmatprep.subr.bf16.mxu0 %v3915_v61  ;;  %2896 = vmatprep.subr.bf16.mxu1 %v4505_v58 }
 0x667   : > { %1856 = vmatpush1.bf16.msra.mxu0 %v3928_v34  ;;  %2897 = vmatpush3.bf16.msra.mxu1 %v3940_v48 }
 0x668   : > { %1857 = vmatprep.subr.bf16.mxu0 %v3933_v62  ;;  %2898 = vmatprep.subr.bf16.mxu1 %v4505_v58 }
 0x66b   : > { %1858 = vmatpush1.bf16.msra.mxu0 %v3946_v40  ;;  %2899 = vmatpush3.bf16.msra.mxu1 %v3956_v45 }
 0x66c   : > { %1859 = vmatprep.subr.bf16.mxu0 %v3951_v47  ;;  %2900 = vmatprep.subr.bf16.mxu1 %v4505_v58 }
 0x66f   : > { %1860 = vmatpush1.bf16.msra.mxu0 %v3962_v33  ;;  %2901 = vmatpush3.bf16.msra.mxu1 %v3972_v42 }
 0x670   : > { %1861 = vmatprep.subr.bf16.mxu0 %v3967_v35  ;;  %2902 = vmatprep.subr.bf16.mxu1 %v4505_v58 }
 0x673   : > { %1862 = vmatpush1.bf16.msra.mxu0 %v3978_v55  ;;  %2903 = vmatpush3.bf16.msra.mxu1 %v3988_v1 }
 0x674   : > { %1863 = vmatprep.subr.bf16.mxu0 %v3983_v49  ;;  %2904 = vmatprep.subr.bf16.mxu1 %v4505_v58 }
 0x677   : > { %1864 = vmatpush1.bf16.msra.mxu0 %v3996_v38  ;;  %2905 = vmatpush3.bf16.msra.mxu1 %v4006_v28 }
 0x678   : > { %1865 = vmatprep.subr.bf16.mxu0 %v4001_v19  ;;  %2906 = vmatprep.subr.bf16.mxu1 %v4505_v58 }
 0x67b   : > { %1866 = vmatpush1.bf16.msra.mxu0 %v4012_v53  ;;  %2907 = vmatpush3.bf16.msra.mxu1 %v4018_v25 }
 0x67c   : > { %1969 = vmatprep.subr.bf16.mxu0 %v3892_v36  ;;  %2912 = vmatprep.subr.bf16.mxu1 %v4505_v58 }
 0x731   : > { %v1766_v52 = vpop.f32.mrb[4].mxu0  ;;  %v1807_v59 = vpop.f32.mrb[4].mxu1 }
 0x732   : > { %v1767_v0 = vadd.f32 %v1766_v52, %v4065_v32  ;;  %v1768_v3 = vpop.f32.mrb[5].mxu0  ;;  %v2890_v51 = vpop.f32.mrb[5].mxu1 }
 0x733   : > { %v1769_v2 = vadd.f32 %v1768_v3, %v4070_v23  ;;  %v1770_v4 = vpop.f32.mrb[6].mxu0  ;;  %v1810_v6 = vpop.f32.mrb[6].mxu1  ;;  %v1808_v3 = vadd.f32 %v1807_v59, %v4087_v29 }
 0x734   : > { %v1814_v50 = vrot.slane %v1767_v0, 7  ;;  %v1771_v7 = vpop.f32.mrb[7].mxu0  ;;  %v2891_v8 = vpop.f32.mrb[7].mxu1 }
 0x735   : > { %v1824_v9 = vrot.slane %v1769_v2, 7  ;;  %v1834_v6 = vrot.slane %v1808_v3, 7 }
 0x736   : > { %v1816_v63 = vadd.f32 %v1814_v50, %v4075_v31 }
 0x737   : > { %v1826_v11 = vadd.f32 %v1824_v9, %v4079_v37 }
 0x738   : > { %v2699_v10 = vmul.f32 -1.442695, %v1816_v63 }
 0x739   : > { %v2700_v12 = vmul.f32 -1.442695, %v1826_v11 }
 0x73a   : > { %3210 = vpow2.f32 %v2699_v10  ;;  %v1842_v10 = vrot.slane %v4095_v43, 7 }
 0x73b   : > { %3212 = vpow2.f32 %v2700_v12 }
 0x744   : > { %v3211_v13 = vpop.eup %3210 }
 0x745   : > { %v1820_v52 = vadd.f32 1.0, %v3211_v13  ;;  %v3213_v51 = vpop.eup %3212 }
 0x746   : > { %v1830_v4 = vadd.f32 1.0, %v3213_v51 }
 0x747   : > { %3214 = vrcp.f32 %v1820_v52 }
 0x748   : > { %3216 = vrcp.f32 %v1830_v4 }
 0x751   : > { %v3215_v0 = vpop.eup %3214 }
 0x752   : > { %v1836_v7 = vmul.f32 %v3215_v0, %v1834_v6  ;;  %v3217_v50 = vpop.eup %3216 }
 0x753   : > { %v1839_v8 = vsub.f32 1.0, %v3217_v50  ;;  %v1844_v9 = vmul.f32 %v3217_v50, %v1842_v10 }
 0x754   : > { %v1837_v2 = vadd.f32 %v1836_v7, %v4092_v5 }
 0x756   : > { %3218 = vtanh.f32 %v1837_v2 }
 0x760   : > { %v3219_v11 = vpop.eup %3218 }
 0x761   : > { %v1840_v12 = vmul.f32 %v3219_v11, %v1839_v8 }
 0x763   : > { %v4141_v13 = vadd.f32 %v1844_v9, %v1840_v12 }
 0x765   : > { %v1846_v59 = vpack.c.bf16 %v4141_v13, %v4141_v13 }
 0x767   : > { %v1848_v63 = vshrl.u32 %v1846_v59, 16 }
 0x769   : > { %1884 = vmatmul.mubr.bf16.vlgmr.msra.gmra.mrb[8].mxu0 %v1848_v63  ;;  %2909 = vmatmul.mubr.bf16.vlgmr.msra.gmra.mrb[8].mxu1 %v1848_v63 }
 0x76a   : > { %1970 = vmatpush1.bf16.msra.mxu0 %v3896_v26  ;;  %2913 = vmatpush3.bf16.msra.mxu1 %v3910_v60 }
 0x76b   : > { %1971 = vmatprep.subr.bf16.mxu0 %v3900_v22  ;;  %2914 = vmatprep.subr.bf16.mxu1 %v4505_v58 }
 0x76c   : > { %2001 = vmatprep.mubr.bf16.mxu0 %v4506_v44  ;;  %2928 = vmatprep.mubr.msk.bf16.mxu1 %vm3432_vm15, %v4505_v58 }
 0x76e   : > { %1972 = vmatpush1.bf16.msra.mxu0 %v3906_v30  ;;  %2915 = vmatpush3.bf16.msra.mxu1 %v3921_v39 }
 0x76f   : > { %1973 = vmatprep.subr.bf16.mxu0 %v3915_v61  ;;  %2916 = vmatprep.subr.bf16.mxu1 %v4505_v58 }
 0x772   : > { %1974 = vmatpush1.bf16.msra.mxu0 %v3928_v34  ;;  %2917 = vmatpush3.bf16.msra.mxu1 %v3940_v48 }
 0x773   : > { %1975 = vmatprep.subr.bf16.mxu0 %v3933_v62  ;;  %2918 = vmatprep.subr.bf16.mxu1 %v4505_v58 }
 0x776   : > { %1976 = vmatpush1.bf16.msra.mxu0 %v3946_v40  ;;  %2919 = vmatpush3.bf16.msra.mxu1 %v3956_v45 }
 0x777   : > { %1977 = vmatprep.subr.bf16.mxu0 %v3951_v47  ;;  %2920 = vmatprep.subr.bf16.mxu1 %v4505_v58 }
 0x77a   : > { %1978 = vmatpush1.bf16.msra.mxu0 %v3962_v33  ;;  %2921 = vmatpush3.bf16.msra.mxu1 %v3972_v42 }
 0x77b   : > { %1979 = vmatprep.subr.bf16.mxu0 %v3967_v35  ;;  %2922 = vmatprep.subr.bf16.mxu1 %v4505_v58 }
 0x77e   : > { %1980 = vmatpush1.bf16.msra.mxu0 %v3978_v55  ;;  %2923 = vmatpush3.bf16.msra.mxu1 %v3988_v1 }
 0x77f   : > { %1981 = vmatprep.subr.bf16.mxu0 %v3983_v49  ;;  %2924 = vmatprep.subr.bf16.mxu1 %v4505_v58 }
 0x782   : > { %1982 = vmatpush1.bf16.msra.mxu0 %v3996_v38  ;;  %2925 = vmatpush3.bf16.msra.mxu1 %v4006_v28 }
 0x783   : > { %1983 = vmatprep.subr.bf16.mxu0 %v4001_v19  ;;  %2926 = vmatprep.subr.bf16.mxu1 %v4505_v58 }
 0x786   : > { %1984 = vmatpush1.bf16.msra.mxu0 %v4012_v53  ;;  %2927 = vmatpush3.bf16.msra.mxu1 %v4018_v25 }
 0x787   : > { %2089 = vmatprep.subr.bf16.mxu0 %v3892_v36  ;;  %2932 = vmatprep.subr.bf16.mxu1 %v4505_v58 }
 0x83c   : > { %v1885_v52 = vpop.f32.mrb[8].mxu0  ;;  %v1926_v51 = vpop.f32.mrb[8].mxu1 }
 0x83d   : > { %v1886_v3 = vadd.f32 %v1885_v52, %v4065_v32  ;;  %v1887_v4 = vpop.f32.mrb[9].mxu0  ;;  %v2910_v6 = vpop.f32.mrb[9].mxu1 }
 0x83e   : > { %v1888_v0 = vadd.f32 %v1887_v4, %v4070_v23  ;;  %v1889_v7 = vpop.f32.mrb[10].mxu0  ;;  %v1929_v2 = vpop.f32.mrb[10].mxu1  ;;  %v1927_v4 = vadd.f32 %v1926_v51, %v4087_v29 }
 0x83f   : > { %v1933_v50 = vrot.slane %v1886_v3, 6  ;;  %v1890_v8 = vpop.f32.mrb[11].mxu0  ;;  %v2911_v10 = vpop.f32.mrb[11].mxu1 }
 0x840   : > { %v1943_v11 = vrot.slane %v1888_v0, 6  ;;  %v1953_v3 = vrot.slane %v1927_v4, 6  ;;  %v1961_v0 = vrot.slane %v4141_v13, 7 }
 0x841   : > { %v1935_v12 = vadd.f32 %v1933_v50, %v4075_v31 }
 0x842   : > { %v1945_v9 = vadd.f32 %v1943_v11, %v4079_v37 }
 0x843   : > { %v2701_v59 = vmul.f32 -1.442695, %v1935_v12 }
 0x844   : > { %v2702_v63 = vmul.f32 -1.442695, %v1945_v9 }
 0x845   : > { %3220 = vpow2.f32 %v2701_v59 }
 0x846   : > { %3222 = vpow2.f32 %v2702_v63 }
 0x84f   : > { %v3221_v14 = vpop.eup %3220 }
 0x850   : > { %v3223_v52 = vpop.eup %3222  ;;  %v1939_v15 = vadd.f32 1.0, %v3221_v14 }
 0x851   : > { %v1949_v6 = vadd.f32 1.0, %v3223_v52 }
 0x852   : > { %3224 = vrcp.f32 %v1939_v15  ;;  %v2560_v15 = vsel %vm2559_vm0, %v4095_v43, %v4141_v13 }
 0x853   : > { %3226 = vrcp.f32 %v1949_v6 }
 0x85c   : > { %v3225_v7 = vpop.eup %3224 }
 0x85d   : > { %v3227_v2 = vpop.eup %3226  ;;  %v1955_v50 = vmul.f32 %v3225_v7, %v1953_v3 }
 0x85e   : > { %v1963_v8 = vmul.f32 %v3227_v2, %v1961_v0  ;;  %v1958_v11 = vsub.f32 1.0, %v3227_v2 }
 0x85f   : > { %v1956_v10 = vadd.f32 %v1955_v50, %v4092_v5 }
 0x861   : > { %3228 = vtanh.f32 %v1956_v10 }
 0x86b   : > { %v3229_v12 = vpop.eup %3228 }
 0x86c   : > { %v1959_v9 = vmul.f32 %v3229_v12, %v1958_v11 }
 0x86e   : > { %v4187_v14 = vadd.f32 %v1963_v8, %v1959_v9 }
 0x870   : > { %v1965_v51 = vpack.c.bf16 %v4187_v14, %v4187_v14  ;;  %v4194_v59 = vsel %vm2561_vm1, %v2560_v15, %v4187_v14 }
 0x872   : > { %v1967_v63 = vrot.slane %v1965_v51, 1 }
 0x874   : > { %2002 = vmatmul.mubr.bf16.vlgmr.msra.gmra.mrb[12].mxu0 %v1967_v63  ;;  %2929 = vmatmul.mubr.bf16.vlgmr.msra.gmra.mrb[12].mxu1 %v1967_v63 }
 0x875   : > { %2090 = vmatpush1.bf16.msra.mxu0 %v3896_v26  ;;  %2933 = vmatpush3.bf16.msra.mxu1 %v3910_v60 }
 0x876   : > { %2091 = vmatprep.subr.bf16.mxu0 %v3900_v22  ;;  %2934 = vmatprep.subr.bf16.mxu1 %v4505_v58 }
 0x877   : > { %2121 = vmatprep.mubr.bf16.mxu0 %v4506_v44  ;;  %2948 = vmatprep.mubr.msk.bf16.mxu1 %vm3432_vm15, %v4505_v58 }
 0x879   : > { %2092 = vmatpush1.bf16.msra.mxu0 %v3906_v30  ;;  %2935 = vmatpush3.bf16.msra.mxu1 %v3921_v39 }
 0x87a   : > { %2093 = vmatprep.subr.bf16.mxu0 %v3915_v61  ;;  %2936 = vmatprep.subr.bf16.mxu1 %v4505_v58 }
 0x87d   : > { %2094 = vmatpush1.bf16.msra.mxu0 %v3928_v34  ;;  %2937 = vmatpush3.bf16.msra.mxu1 %v3940_v48 }
 0x87e   : > { %2095 = vmatprep.subr.bf16.mxu0 %v3933_v62  ;;  %2938 = vmatprep.subr.bf16.mxu1 %v4505_v58 }
 0x881   : > { %2096 = vmatpush1.bf16.msra.mxu0 %v3946_v40  ;;  %2939 = vmatpush3.bf16.msra.mxu1 %v3956_v45 }
 0x882   : > { %2097 = vmatprep.subr.bf16.mxu0 %v3951_v47  ;;  %2940 = vmatprep.subr.bf16.mxu1 %v4505_v58 }
 0x885   : > { %2098 = vmatpush1.bf16.msra.mxu0 %v3962_v33  ;;  %2941 = vmatpush3.bf16.msra.mxu1 %v3972_v42 }
 0x886   : > { %2099 = vmatprep.subr.bf16.mxu0 %v3967_v35  ;;  %2942 = vmatprep.subr.bf16.mxu1 %v4505_v58 }
 0x889   : > { %2100 = vmatpush1.bf16.msra.mxu0 %v3978_v55  ;;  %2943 = vmatpush3.bf16.msra.mxu1 %v3988_v1 }
 0x88a   : > { %2101 = vmatprep.subr.bf16.mxu0 %v3983_v49  ;;  %2944 = vmatprep.subr.bf16.mxu1 %v4505_v58 }
 0x88d   : > { %2102 = vmatpush1.bf16.msra.mxu0 %v3996_v38  ;;  %2945 = vmatpush3.bf16.msra.mxu1 %v4006_v28 }
 0x88e   : > { %2103 = vmatprep.subr.bf16.mxu0 %v4001_v19  ;;  %2946 = vmatprep.subr.bf16.mxu1 %v4505_v58 }
 0x891   : > { %2104 = vmatpush1.bf16.msra.mxu0 %v4012_v53  ;;  %2947 = vmatpush3.bf16.msra.mxu1 %v4018_v25 }
 0x892   : > { %2207 = vmatprep.subr.bf16.mxu0 %v3892_v36  ;;  %2952 = vmatprep.subr.bf16.mxu1 %v4505_v58 }
 0x947   : > { %v2003_v43 = vpop.f32.mrb[12].mxu0  ;;  %v2044_v13 = vpop.f32.mrb[12].mxu1 }
 0x948   : > { %v2004_v52 = vadd.f32 %v2003_v43, %v4065_v32  ;;  %v2005_v6 = vpop.f32.mrb[13].mxu0  ;;  %v2930_v4 = vpop.f32.mrb[13].mxu1 }
 0x949   : > { %v2006_v3 = vadd.f32 %v2005_v6, %v4070_v23  ;;  %v2007_v7 = vpop.f32.mrb[14].mxu0  ;;  %v2047_v0 = vpop.f32.mrb[14].mxu1  ;;  %v2045_v6 = vadd.f32 %v2044_v13, %v4087_v29 }
 0x94a   : > { %v2051_v2 = vrot.slane %v2004_v52, 5  ;;  %v2008_v50 = vpop.f32.mrb[15].mxu0  ;;  %v2931_v8 = vpop.f32.mrb[15].mxu1 }
 0x94b   : > { %v2061_v10 = vrot.slane %v2006_v3, 5  ;;  %v2071_v52 = vrot.slane %v2045_v6, 5  ;;  %v2079_v3 = vrot.slane %v4187_v14, 7 }
 0x94c   : > { %v2053_v11 = vadd.f32 %v2051_v2, %v4075_v31 }
 0x94d   : > { %v2063_v12 = vadd.f32 %v2061_v10, %v4079_v37 }
 0x94e   : > { %v2703_v9 = vmul.f32 -1.442695, %v2053_v11 }
 0x94f   : > { %v2704_v15 = vmul.f32 -1.442695, %v2063_v12 }
 0x950   : > { %3230 = vpow2.f32 %v2703_v9 }
 0x951   : > { %3232 = vpow2.f32 %v2704_v15 }
 0x95a   : > { %v3231_v51 = vpop.eup %3230 }
 0x95b   : > { %v3233_v63 = vpop.eup %3232  ;;  %v2057_v43 = vadd.f32 1.0, %v3231_v51 }
 0x95c   : > { %v2067_v4 = vadd.f32 1.0, %v3233_v63 }
 0x95d   : > { %3234 = vrcp.f32 %v2057_v43 }
 0x95e   : > { %3236 = vrcp.f32 %v2067_v4 }
 0x967   : > { %v3235_v7 = vpop.eup %3234 }
 0x968   : > { %v3237_v0 = vpop.eup %3236  ;;  %v2073_v2 = vmul.f32 %v3235_v7, %v2071_v52 }
 0x969   : > { %v2081_v50 = vmul.f32 %v3237_v0, %v2079_v3  ;;  %v2076_v10 = vsub.f32 1.0, %v3237_v0 }
 0x96a   : > { %v2074_v8 = vadd.f32 %v2073_v2, %v4092_v5 }
 0x96c   : > { %3238 = vtanh.f32 %v2074_v8 }
 0x976   : > { %v3239_v11 = vpop.eup %3238 }
 0x977   : > { %v2077_v12 = vmul.f32 %v3239_v11, %v2076_v10 }
 0x979   : > { %v4238_v9 = vadd.f32 %v2081_v50, %v2077_v12 }
 0x97b   : > { %v2083_v15 = vpack.c.bf16 %v4238_v9, %v4238_v9  ;;  %v4244_v13 = vsel %vm2563_vm2, %v4194_v59, %v4238_v9 }
 0x97d   : > { %v2085_v14 = vshrl.u32 %v2083_v15, 16 }
 0x97f   : > { %v2087_v51 = vrot.slane %v2085_v14, 1 }
 0x981   : > { %2122 = vmatmul.mubr.bf16.vlgmr.msra.gmra.mrb[16].mxu0 %v2087_v51  ;;  %2949 = vmatmul.mubr.bf16.vlgmr.msra.gmra.mrb[16].mxu1 %v2087_v51 }
 0x982   : > { %2208 = vmatpush1.bf16.msra.mxu0 %v3896_v26  ;;  %2953 = vmatpush3.bf16.msra.mxu1 %v3910_v60 }
 0x983   : > { %2209 = vmatprep.subr.bf16.mxu0 %v3900_v22  ;;  %2954 = vmatprep.subr.bf16.mxu1 %v4505_v58 }
 0x984   : > { %2239 = vmatprep.mubr.bf16.mxu0 %v4506_v44  ;;  %2968 = vmatprep.mubr.msk.bf16.mxu1 %vm3432_vm15, %v4505_v58 }
 0x986   : > { %2210 = vmatpush1.bf16.msra.mxu0 %v3906_v30  ;;  %2955 = vmatpush3.bf16.msra.mxu1 %v3921_v39 }
 0x987   : > { %2211 = vmatprep.subr.bf16.mxu0 %v3915_v61  ;;  %2956 = vmatprep.subr.bf16.mxu1 %v4505_v58 }
 0x98a   : > { %2212 = vmatpush1.bf16.msra.mxu0 %v3928_v34  ;;  %2957 = vmatpush3.bf16.msra.mxu1 %v3940_v48 }
 0x98b   : > { %2213 = vmatprep.subr.bf16.mxu0 %v3933_v62  ;;  %2958 = vmatprep.subr.bf16.mxu1 %v4505_v58 }
 0x98e   : > { %2214 = vmatpush1.bf16.msra.mxu0 %v3946_v40  ;;  %2959 = vmatpush3.bf16.msra.mxu1 %v3956_v45 }
 0x98f   : > { %2215 = vmatprep.subr.bf16.mxu0 %v3951_v47  ;;  %2960 = vmatprep.subr.bf16.mxu1 %v4505_v58 }
 0x992   : > { %2216 = vmatpush1.bf16.msra.mxu0 %v3962_v33  ;;  %2961 = vmatpush3.bf16.msra.mxu1 %v3972_v42 }
 0x993   : > { %2217 = vmatprep.subr.bf16.mxu0 %v3967_v35  ;;  %2962 = vmatprep.subr.bf16.mxu1 %v4505_v58 }
 0x996   : > { %2218 = vmatpush1.bf16.msra.mxu0 %v3978_v55  ;;  %2963 = vmatpush3.bf16.msra.mxu1 %v3988_v1 }
 0x997   : > { %2219 = vmatprep.subr.bf16.mxu0 %v3983_v49  ;;  %2964 = vmatprep.subr.bf16.mxu1 %v4505_v58 }
 0x99a   : > { %2220 = vmatpush1.bf16.msra.mxu0 %v3996_v38  ;;  %2965 = vmatpush3.bf16.msra.mxu1 %v4006_v28 }
 0x99b   : > { %2221 = vmatprep.subr.bf16.mxu0 %v4001_v19  ;;  %2966 = vmatprep.subr.bf16.mxu1 %v4505_v58 }
 0x99e   : > { %2222 = vmatpush1.bf16.msra.mxu0 %v4012_v53  ;;  %2967 = vmatpush3.bf16.msra.mxu1 %v4018_v25 }
 0x99f   : > { %2327 = vmatprep.subr.bf16.mxu0 %v3892_v36  ;;  %2972 = vmatprep.subr.bf16.mxu1 %v4505_v58 }
 0xa54   : > { %v2123_v59 = vpop.f32.mrb[16].mxu0  ;;  %v2164_v63 = vpop.f32.mrb[16].mxu1 }
 0xa55   : > { %v2124_v43 = vadd.f32 %v2123_v59, %v4065_v32  ;;  %v2125_v4 = vpop.f32.mrb[17].mxu0  ;;  %v2950_v6 = vpop.f32.mrb[17].mxu1 }
 0xa56   : > { %v2126_v52 = vadd.f32 %v2125_v4, %v4070_v23  ;;  %v2127_v7 = vpop.f32.mrb[18].mxu0  ;;  %v2167_v3 = vpop.f32.mrb[18].mxu1  ;;  %v2165_v4 = vadd.f32 %v2164_v63, %v4087_v29 }
 0xa57   : > { %v2171_v0 = vrot.slane %v2124_v43, 4  ;;  %v2128_v2 = vpop.f32.mrb[19].mxu0  ;;  %v2951_v50 = vpop.f32.mrb[19].mxu1 }
 0xa58   : > { %v2181_v8 = vrot.slane %v2126_v52, 4  ;;  %v2191_v43 = vrot.slane %v2165_v4, 4  ;;  %v2199_v52 = vrot.slane %v4238_v9, 7 }
 0xa59   : > { %v2173_v10 = vadd.f32 %v2171_v0, %v4075_v31 }
 0xa5a   : > { %v2183_v11 = vadd.f32 %v2181_v8, %v4079_v37 }
 0xa5b   : > { %v2705_v12 = vmul.f32 -1.442695, %v2173_v10 }
 0xa5c   : > { %v2706_v15 = vmul.f32 -1.442695, %v2183_v11 }
 0xa5d   : > { %3240 = vpow2.f32 %v2705_v12 }
 0xa5e   : > { %3242 = vpow2.f32 %v2706_v15 }
 0xa67   : > { %v3241_v14 = vpop.eup %3240 }
 0xa68   : > { %v3243_v51 = vpop.eup %3242  ;;  %v2177_v59 = vadd.f32 1.0, %v3241_v14 }
 0xa69   : > { %v2187_v6 = vadd.f32 1.0, %v3243_v51 }
 0xa6a   : > { %3244 = vrcp.f32 %v2177_v59 }
 0xa6b   : > { %3246 = vrcp.f32 %v2187_v6 }
 0xa74   : > { %v3245_v7 = vpop.eup %3244 }
 0xa75   : > { %v3247_v3 = vpop.eup %3246  ;;  %v2193_v0 = vmul.f32 %v3245_v7, %v2191_v43 }
 0xa76   : > { %v2201_v2 = vmul.f32 %v3247_v3, %v2199_v52  ;;  %v2196_v8 = vsub.f32 1.0, %v3247_v3 }
 0xa77   : > { %v2194_v50 = vadd.f32 %v2193_v0, %v4092_v5 }
 0xa79   : > { %3248 = vtanh.f32 %v2194_v50 }
 0xa83   : > { %v3249_v10 = vpop.eup %3248 }
 0xa84   : > { %v2197_v11 = vmul.f32 %v3249_v10, %v2196_v8 }
 0xa86   : > { %v4288_v12 = vadd.f32 %v2201_v2, %v2197_v11 }
 0xa88   : > { %v2203_v15 = vpack.c.bf16 %v4288_v12, %v4288_v12  ;;  %v4294_v63 = vsel %vm2565_vm3, %v4244_v13, %v4288_v12 }
 0xa8a   : > { %v2205_v9 = vrot.slane %v2203_v15, 2 }
 0xa8c   : > { %2240 = vmatmul.mubr.bf16.vlgmr.msra.gmra.mrb[20].mxu0 %v2205_v9  ;;  %2969 = vmatmul.mubr.bf16.vlgmr.msra.gmra.mrb[20].mxu1 %v2205_v9 }
 0xa8d   : > { %2328 = vmatpush1.bf16.msra.mxu0 %v3896_v26  ;;  %2973 = vmatpush3.bf16.msra.mxu1 %v3910_v60 }
 0xa8e   : > { %2329 = vmatprep.subr.bf16.mxu0 %v3900_v22  ;;  %2974 = vmatprep.subr.bf16.mxu1 %v4505_v58 }
 0xa8f   : > { %2359 = vmatprep.mubr.bf16.mxu0 %v4506_v44  ;;  %2988 = vmatprep.mubr.msk.bf16.mxu1 %vm3432_vm15, %v4505_v58 }
 0xa91   : > { %2330 = vmatpush1.bf16.msra.mxu0 %v3906_v30  ;;  %2975 = vmatpush3.bf16.msra.mxu1 %v3921_v39 }
 0xa92   : > { %2331 = vmatprep.subr.bf16.mxu0 %v3915_v61  ;;  %2976 = vmatprep.subr.bf16.mxu1 %v4505_v58 }
 0xa95   : > { %2332 = vmatpush1.bf16.msra.mxu0 %v3928_v34  ;;  %2977 = vmatpush3.bf16.msra.mxu1 %v3940_v48 }
 0xa96   : > { %2333 = vmatprep.subr.bf16.mxu0 %v3933_v62  ;;  %2978 = vmatprep.subr.bf16.mxu1 %v4505_v58 }
 0xa99   : > { %2334 = vmatpush1.bf16.msra.mxu0 %v3946_v40  ;;  %2979 = vmatpush3.bf16.msra.mxu1 %v3956_v45 }
 0xa9a   : > { %2335 = vmatprep.subr.bf16.mxu0 %v3951_v47  ;;  %2980 = vmatprep.subr.bf16.mxu1 %v4505_v58 }
 0xa9d   : > { %2336 = vmatpush1.bf16.msra.mxu0 %v3962_v33  ;;  %2981 = vmatpush3.bf16.msra.mxu1 %v3972_v42 }
 0xa9e   : > { %2337 = vmatprep.subr.bf16.mxu0 %v3967_v35  ;;  %2982 = vmatprep.subr.bf16.mxu1 %v4505_v58 }
 0xaa1   : > { %2338 = vmatpush1.bf16.msra.mxu0 %v3978_v55  ;;  %2983 = vmatpush3.bf16.msra.mxu1 %v3988_v1 }
 0xaa2   : > { %2339 = vmatprep.subr.bf16.mxu0 %v3983_v49  ;;  %2984 = vmatprep.subr.bf16.mxu1 %v4505_v58 }
 0xaa5   : > { %2340 = vmatpush1.bf16.msra.mxu0 %v3996_v38  ;;  %2985 = vmatpush3.bf16.msra.mxu1 %v4006_v28 }
 0xaa6   : > { %2341 = vmatprep.subr.bf16.mxu0 %v4001_v19  ;;  %2986 = vmatprep.subr.bf16.mxu1 %v4505_v58 }
 0xaa9   : > { %2342 = vmatpush1.bf16.msra.mxu0 %v4012_v53  ;;  %2987 = vmatpush3.bf16.msra.mxu1 %v4018_v25 }
 0xaaa   : > { %2445 = vmatprep.subr.bf16.mxu0 %v3892_v36  ;;  %2992 = vmatprep.subr.bf16.mxu1 %v4505_v58 }
 0xb5f   : > { %v2241_v13 = vpop.f32.mrb[20].mxu0  ;;  %v2282_v14 = vpop.f32.mrb[20].mxu1 }
 0xb60   : > { %v2242_v51 = vadd.f32 %v2241_v13, %v4065_v32  ;;  %v2243_v59 = vpop.f32.mrb[21].mxu0  ;;  %v2970_v6 = vpop.f32.mrb[21].mxu1 }
 0xb61   : > { %v2244_v4 = vadd.f32 %v2243_v59, %v4070_v23  ;;  %v2245_v43 = vpop.f32.mrb[22].mxu0  ;;  %v2285_v7 = vpop.f32.mrb[22].mxu1  ;;  %v2283_v59 = vadd.f32 %v2282_v14, %v4087_v29 }
 0xb62   : > { %v2289_v52 = vrot.slane %v2242_v51, 3  ;;  %v2246_v3 = vpop.f32.mrb[23].mxu0  ;;  %v2971_v0 = vpop.f32.mrb[23].mxu1 }
 0xb63   : > { %v2299_v2 = vrot.slane %v2244_v4, 3  ;;  %v2309_v51 = vrot.slane %v2283_v59, 3  ;;  %v2317_v4 = vrot.slane %v4288_v12, 7 }
 0xb64   : > { %v2291_v50 = vadd.f32 %v2289_v52, %v4075_v31 }
 0xb65   : > { %v2301_v36 = vadd.f32 %v2299_v2, %v4079_v37 }
 0xb66   : > { %v2707_v8 = vmul.f32 -1.442695, %v2291_v50 }
 0xb67   : > { %v2708_v10 = vmul.f32 -1.442695, %v2301_v36 }
 0xb68   : > { %3250 = vpow2.f32 %v2707_v8 }
 0xb69   : > { %3252 = vpow2.f32 %v2708_v10 }
 0xb72   : > { %v3251_v11 = vpop.eup %3250 }
 0xb73   : > { %v3253_v15 = vpop.eup %3252  ;;  %v2295_v9 = vadd.f32 1.0, %v3251_v11 }
 0xb74   : > { %v2305_v13 = vadd.f32 1.0, %v3253_v15 }
 0xb75   : > { %3254 = vrcp.f32 %v2295_v9 }
 0xb76   : > { %3256 = vrcp.f32 %v2305_v13 }
 0xb7f   : > { %v3255_v6 = vpop.eup %3254 }
 0xb80   : > { %v3257_v43 = vpop.eup %3256  ;;  %v2311_v7 = vmul.f32 %v3255_v6, %v2309_v51 }
 0xb81   : > { %v2319_v52 = vmul.f32 %v3257_v43, %v2317_v4  ;;  %v2314_v0 = vsub.f32 1.0, %v3257_v43 }
 0xb82   : > { %v2312_v3 = vadd.f32 %v2311_v7, %v4092_v5 }
 0xb84   : > { %3258 = vtanh.f32 %v2312_v3 }
 0xb8e   : > { %v3259_v2 = vpop.eup %3258 }
 0xb8f   : > { %v2315_v50 = vmul.f32 %v3259_v2, %v2314_v0 }
 0xb91   : > { %v4338_v36 = vadd.f32 %v2319_v52, %v2315_v50 }
 0xb93   : > { %v2321_v8 = vpack.c.bf16 %v4338_v36, %v4338_v36  ;;  %v4344_v14 = vsel %vm2567_vm4, %v4294_v63, %v4338_v36 }
 0xb95   : > { %v2323_v12 = vshrl.u32 %v2321_v8, 16 }
 0xb97   : > { %v2325_v10 = vrot.slane %v2323_v12, 2 }
 0xb99   : > { %2360 = vmatmul.mubr.bf16.vlgmr.msra.gmra.mrb[24].mxu0 %v2325_v10  ;;  %2989 = vmatmul.mubr.bf16.vlgmr.msra.gmra.mrb[24].mxu1 %v2325_v10 }
 0xb9a   : > { %2446 = vmatpush1.bf16.msra.mxu0 %v3896_v26  ;;  %2993 = vmatpush3.bf16.msra.mxu1 %v3910_v60 }
 0xb9b   : > { %2447 = vmatprep.subr.bf16.mxu0 %v3900_v22  ;;  %2994 = vmatprep.subr.bf16.mxu1 %v4505_v58 }
 0xb9c   : > { %2477 = vmatprep.mubr.bf16.mxu0 %v4506_v44  ;;  %3008 = vmatprep.mubr.msk.bf16.mxu1 %vm3432_vm15, %v4505_v58 }
 0xb9e   : > { %2448 = vmatpush1.bf16.msra.mxu0 %v3906_v30  ;;  %2995 = vmatpush3.bf16.msra.mxu1 %v3921_v39 }
 0xb9f   : > { %2449 = vmatprep.subr.bf16.mxu0 %v3915_v61  ;;  %2996 = vmatprep.subr.bf16.mxu1 %v4505_v58 }
 0xba2   : > { %2450 = vmatpush1.bf16.msra.mxu0 %v3928_v34  ;;  %2997 = vmatpush3.bf16.msra.mxu1 %v3940_v48 }
 0xba3   : > { %2451 = vmatprep.subr.bf16.mxu0 %v3933_v62  ;;  %2998 = vmatprep.subr.bf16.mxu1 %v4505_v58 }
 0xba6   : > { %2452 = vmatpush1.bf16.msra.mxu0 %v3946_v40  ;;  %2999 = vmatpush3.bf16.msra.mxu1 %v3956_v45 }
 0xba7   : > { %2453 = vmatprep.subr.bf16.mxu0 %v3951_v47  ;;  %3000 = vmatprep.subr.bf16.mxu1 %v4505_v58 }
 0xbaa   : > { %2454 = vmatpush1.bf16.msra.mxu0 %v3962_v33  ;;  %3001 = vmatpush3.bf16.msra.mxu1 %v3972_v42 }
 0xbab   : > { %2455 = vmatprep.subr.bf16.mxu0 %v3967_v35  ;;  %3002 = vmatprep.subr.bf16.mxu1 %v4505_v58 }
 0xbae   : > { %2456 = vmatpush1.bf16.msra.mxu0 %v3978_v55  ;;  %3003 = vmatpush3.bf16.msra.mxu1 %v3988_v1 }
 0xbaf   : > { %2457 = vmatprep.subr.bf16.mxu0 %v3983_v49  ;;  %3004 = vmatprep.subr.bf16.mxu1 %v4505_v58 }
 0xbb2   : > { %2458 = vmatpush1.bf16.msra.mxu0 %v3996_v38  ;;  %3005 = vmatpush3.bf16.msra.mxu1 %v4006_v28 }
 0xbb3   : > { %2459 = vmatprep.subr.bf16.mxu0 %v4001_v19  ;;  %3006 = vmatprep.subr.bf16.mxu1 %v4505_v58  ;;  %v2437_v58 = vrot.slane %v4338_v36, 7 }
 0xbb6   : > { %2460 = vmatpush1.bf16.msra.mxu0 %v4012_v53  ;;  %3007 = vmatpush3.bf16.msra.mxu1 %v4018_v25 }
 0xc6c   : > { %v2361_v26 = vpop.f32.mrb[24].mxu0  ;;  %v2402_v22 = vpop.f32.mrb[24].mxu1 }
 0xc6d   : > { %v2362_v30 = vadd.f32 %v2361_v26, %v4065_v32  ;;  %v2363_v60 = vpop.f32.mrb[25].mxu0  ;;  %v2990_v61 = vpop.f32.mrb[25].mxu1  ;;  %v2403_v28 = vadd.f32 %v2402_v22, %v4087_v29  ;;  %v3281_v22 = vld [vmem:[%s4072_s13 + $0x8] sm:$0xff] }
 0xc6e   : > { %v2364_v39 = vadd.f32 %v2363_v60, %v4070_v23  ;;  %v2365_v34 = vpop.f32.mrb[26].mxu0  ;;  %v2405_v62 = vpop.f32.mrb[26].mxu1 }
 0xc6f   : > { %v2409_v48 = vrot.slane %v2362_v30, 2  ;;  %v2366_v40 = vpop.f32.mrb[27].mxu0  ;;  %v2991_v47 = vpop.f32.mrb[27].mxu1  ;;  %v2429_v53 = vrot.slane %v2403_v28, 2 }
 0xc70   : > { %v2419_v45 = vrot.slane %v2364_v39, 2 }
 0xc71   : > { %v2411_v33 = vadd.f32 %v2409_v48, %v4075_v31 }
 0xc72   : > { %v2421_v35 = vadd.f32 %v2419_v45, %v4079_v37 }
 0xc73   : > { %v2709_v42 = vmul.f32 -1.442695, %v2411_v33 }
 0xc74   : > { %v2710_v55 = vmul.f32 -1.442695, %v2421_v35 }
 0xc75   : > { %3260 = vpow2.f32 %v2709_v42 }
 0xc76   : > { %3262 = vpow2.f32 %v2710_v55 }
 0xc7f   : > { %v3261_v49 = vpop.eup %3260 }
 0xc80   : > { %v3263_v1 = vpop.eup %3262  ;;  %v2415_v38 = vadd.f32 1.0, %v3261_v49 }
 0xc81   : > { %v2425_v19 = vadd.f32 1.0, %v3263_v1 }
 0xc82   : > { %3264 = vrcp.f32 %v2415_v38 }
 0xc83   : > { %3266 = vrcp.f32 %v2425_v19 }
 0xc8c   : > { %v3265_v25 = vpop.eup %3264 }
 0xc8d   : > { %v3267_v44 = vpop.eup %3266  ;;  %v2431_v31 = vmul.f32 %v3265_v25, %v2429_v53 }
 0xc8e   : > { %v2439_v63 = vmul.f32 %v3267_v44, %v2437_v58  ;;  %v2434_v11 = vsub.f32 1.0, %v3267_v44 }
 0xc8f   : > { %v2432_v37 = vadd.f32 %v2431_v31, %v4092_v5 }
 0xc91   : > { %3268 = vtanh.f32 %v2432_v37 }
 0xc9b   : > { %v3269_v15 = vpop.eup %3268 }
 0xc9c   : > { %v2435_v9 = vmul.f32 %v3269_v15, %v2434_v11 }
 0xc9e   : > { %v2440_v13 = vadd.f32 %v2439_v63, %v2435_v9 }
 0xca0   : > { %v2441_v59 = vpack.c.bf16 %v2440_v13, %v2440_v13  ;;  %v2570_v51 = vsel %vm2569_vm5, %v4344_v14, %v2440_v13  ;;  %v3280_v14 = vld [vmem:[%s4072_s13] sm:$0xff]  ;;  %v2555_v47 = vrot.slane %v2440_v13, 7 }
 0xca2   : > { %v2443_v6 = vrot.slane %v2441_v59, 3 }
 0xca4   : > { %2478 = vmatmul.mubr.bf16.vlgmr.msra.gmra.mrb[28].mxu0 %v2443_v6  ;;  %3009 = vmatmul.mubr.bf16.vlgmr.msra.gmra.mrb[28].mxu1 %v2443_v6 }
 0xd77   : > { %v2479_v4 = vpop.f32.mrb[28].mxu0  ;;  %v2520_v43 = vpop.f32.mrb[28].mxu1 }
 0xd78   : > { %v2480_v7 = vadd.f32 %v2479_v4, %v4065_v32  ;;  %v2481_v52 = vpop.f32.mrb[29].mxu0  ;;  %v3010_v3 = vpop.f32.mrb[29].mxu1 }
 0xd79   : > { %v2482_v0 = vadd.f32 %v2481_v52, %v4070_v23  ;;  %v2483_v2 = vpop.f32.mrb[30].mxu0  ;;  %v2523_v50 = vpop.f32.mrb[30].mxu1  ;;  %v2521_v23 = vadd.f32 %v2520_v43, %v4087_v29 }
 0xd7a   : > { %v2527_v36 = vrot.slane %v2480_v7, 1  ;;  %v2484_v8 = vpop.f32.mrb[31].mxu0  ;;  %v3011_v12 = vpop.f32.mrb[31].mxu1 }
 0xd7b   : > { %v2537_v10 = vrot.slane %v2482_v0, 1  ;;  %v2547_v48 = vrot.slane %v2521_v23, 1 }
 0xd7c   : > { %v2529_v26 = vadd.f32 %v3280_v14, %v2527_v36 }
 0xd7d   : > { %v2539_v30 = vadd.f32 %v3281_v22, %v2537_v10 }
 0xd7e   : > { %v2711_v60 = vmul.f32 -1.442695, %v2529_v26 }
 0xd7f   : > { %v2712_v61 = vmul.f32 -1.442695, %v2539_v30 }
 0xd80   : > { %3270 = vpow2.f32 %v2711_v60 }
 0xd81   : > { %3272 = vpow2.f32 %v2712_v61 }
 0xd8a   : > { %v3271_v39 = vpop.eup %3270 }
 0xd8b   : > { %v3273_v32 = vpop.eup %3272  ;;  %v2533_v34 = vadd.f32 1.0, %v3271_v39 }
 0xd8c   : > { %v2543_v62 = vadd.f32 1.0, %v3273_v32 }
 0xd8d   : > { %3274 = vrcp.f32 %v2533_v34 }
 0xd8e   : > { %3276 = vrcp.f32 %v2543_v62 }
 0xd97   : > { %v3275_v40 = vpop.eup %3274 }
 0xd98   : > { %v3277_v45 = vpop.eup %3276  ;;  %v2549_v33 = vmul.f32 %v3275_v40, %v2547_v48 }
 0xd99   : > { %v2557_v35 = vmul.f32 %v3277_v45, %v2555_v47  ;;  %v2552_v55 = vsub.f32 1.0, %v3277_v45 }
 0xd9a   : > { %v2550_v42 = vadd.f32 %v2549_v33, %v4092_v5 }
 0xd9c   : > { %3278 = vtanh.f32 %v2550_v42 }
 0xda6   : > { %v3279_v49 = vpop.eup %3278  ;;  %1464 = sbr.rel (!%p1462_p4) target bundleno = 1329 (0x531), region = 74 }
 0xda7   : > { %v2553_v1 = vmul.f32 %v3279_v49, %v2552_v55 }
 0xda9   : > { %v2558_v58 = vadd.f32 %v2557_v35, %v2553_v1  }
 0xdab   : > { %v2572_v38 = vsel %vm2571_vm6, %v2570_v51, %v2558_v58 }
 0xdac   : > { %2574 = vst [vmem:[%s2573_s14] sm:$0xff] %v2572_v38 }
 0xdad   :  { %3381 = shalt.err (!%p3378_p9)
}
 0xdae   :  { %s3382_s19 = scalar_lea.hbm %s4422_s7, 256 }
 0xdaf   :  { %p3383_p10 = scmp.ne.s32.totalorder %s4422_s7, %s3382_s19  ;;  %p3386_p11 = scmp.lt.u32.totalorder %s3382_s19, %s4422_s7 }
 0xdb1   :  { %p3388_p12 = pnand %p3386_p11, %p3383_p10 }
 0xdb3   :  { %3391 = shalt.err (!%p3388_p12)
}
 0xdb4   :  { %2586 = dma.vmem_to_hbm [thread:$0]  %s2581_s15, 256, %s4422_s7, [#allocation8], %s3420_s1, %s3420_s1, %s3421_s25  }
 0xdb5   :  { %3406 = dma.done.wait [#allocation8], 256  }
 0xdb6   :  { %3407 = vsyncadd [#allocation8], 4294967040 }
 0xdb7   :  { %2590 = vsyncpa [#allocation7], 1 }
 0xdb8   :  { %2591 = vsyncpa [#allocation10], 1 }
 0xdb9   :  { %2592 = vsyncpa [#allocation13], 1 }
 0xdba   :  { %2593 = vsyncpa [#allocation8], 1 }

</bundles_post_ra>
